<compile_context>
chip_gen: v7x
topology: tpu7x:2x2x1
jax: 0.10.0
libtpu: 0.0.40
codegen_flags: <defaults>
</compile_context>

<pallas_src>
import functools

import jax
import jax.numpy as jnp
from jax.experimental import pallas as pl
from jax.experimental.pallas import tpu as pltpu

DEQ_EXPAND = 5
NUM_GROUPS = 4
GN_EPS = 1e-5
LANE = 128
SUBLANE = 8


def _round_up(x, m):
    return (x + m - 1) // m * m


def _tap_stack(a, Wp, Ppad):
    """Stack the 9 3x3-conv tap views of `a` along the sublane axis.

    a:    (C, Ppad) with the zero ring of the padded plane already in place.
    Tap (ky, kx) needs a[:, p + d] with d = (ky-1)*Wp + (kx-1); rolling the lane
    axis by (-d) mod Ppad provides exactly that for every interior output lane.
    Wrapped lanes only land on border / dead outputs, which are masked off
    afterwards, and the rotation runs on the XLU (a VLIW slot that is otherwise
    idle here). Returns (9*C, Ppad).
    """
    taps = []
    for ky in range(3):
        for kx in range(3):
            d = (ky - 1) * Wp + (kx - 1)
            if d == 0:
                taps.append(a)
            else:
                taps.append(pltpu.roll(a, shift=(-d) % Ppad, axis=1))
    return jnp.concatenate(taps, axis=0)


def _group_norm(y, comb, gamma, beta):
    """GroupNorm, reduce-then-combine.

    y:     (C, Ppad) f32 with border / dead lanes already zeroed.
    comb:  (C, C) same-group indicator pre-scaled by 1/(H*W*channels_per_group);
           rows for zero-padded channels are all zero (their output is 0*...+0).
    gamma, beta: (C, 1) per-channel affine params (0 for padded channels).
    """
    s = jnp.sum(y, axis=1, keepdims=True)           # (C, 1) lane reduce (XLU)
    ss = jnp.sum(y * y, axis=1, keepdims=True)      # (C, 1)
    mu = jnp.dot(comb, s, preferred_element_type=jnp.float32)    # E[x]   per group
    ex2 = jnp.dot(comb, ss, preferred_element_type=jnp.float32)  # E[x^2] per group
    var = ex2 - mu * mu
    rsig = jax.lax.rsqrt(var + GN_EPS)
    return (y - mu) * (rsig * gamma) + beta


def basic_block_kernel(Wp, Ppad,
                       x_ref, w1_ref, w2_ref, a1_ref, a2_ref,
                       g1_ref, b1_ref, g2_ref, b2_ref, g3_ref, b3_ref,
                       mask_ref, o_ref):
    x = x_ref[0]                      # (Cin_p, Ppad), zero ring + zero pad channels
    mask = mask_ref[...]              # (1, Ppad) float {0,1}, interior positions
    a1 = a1_ref[...]
    a2 = a2_ref[...]

    # conv1 as a single MXU matmul over the stacked taps -> gn1 -> relu.
    y = jnp.dot(w1_ref[...], _tap_stack(x, Wp, Ppad),
                preferred_element_type=jnp.float32)          # (Cmid_p, Ppad)
    y = y * mask
    y = _group_norm(y, a1, g1_ref[...], b1_ref[...])
    y = jnp.maximum(y, 0.0) * mask    # zeroed ring doubles as conv2's SAME padding

    # conv2 (dropout p=0 and injection=0 are identities) -> gn2.
    z = jnp.dot(w2_ref[...], _tap_stack(y, Wp, Ppad),
                preferred_element_type=jnp.float32)          # (Cout_p, Ppad)
    z = z * mask
    z = _group_norm(z, a2, g2_ref[...], b2_ref[...])

    # residual add -> relu -> gn3.
    r = jnp.maximum(z + x, 0.0) * mask
    o_ref[0] = _group_norm(r, a2, g3_ref[...], b3_ref[...]).astype(o_ref.dtype)


def basic_block_forward(x_nchw, params):
    """params = (w1, g1, b1, w2, g2, b2, g3, b3); conv weights HWIO, gn params (1, C)."""
    w1, g1, b1, w2, g2, b2, g3, b3 = params
    N, Cin, H, W = x_nchw.shape
    Cmid = w1.shape[-1]
    Cout = w2.shape[-1]
    assert Cin == Cout, "residual add requires inplanes == planes"
    assert Cmid % NUM_GROUPS == 0 and Cout % NUM_GROUPS == 0

    Hp, Wp = H + 2, W + 2
    P = Hp * Wp
    Ppad = _round_up(P, LANE)            # lane-dense plane (384 for 16x16)
    Cin_p = _round_up(Cin, SUBLANE)      # 4  -> 8
    Cmid_p = _round_up(Cmid, SUBLANE)    # 20 -> 24
    Cout_p = _round_up(Cout, SUBLANE)    # 4  -> 8
    hw = H * W
    f32 = jnp.float32

    # Activations: channels on sublanes (zero-padded to 8), zero-ring-padded plane
    # flattened onto lanes and padded to a multiple of 128.
    xp = jnp.pad(x_nchw, ((0, 0), (0, Cin_p - Cin), (1, 1), (1, 1)))
    xp = jnp.pad(xp.reshape(N, Cin_p, P), ((0, 0), (0, 0), (0, Ppad - P))).astype(f32)

    # Conv weights HWIO -> lane-dense slabs (Cout_p, 9*Cin_p): one matmul per conv.
    # Column order (tap-major, then cin) matches the row order of _tap_stack.
    def weight_slab(w, co_pad, ci_pad):
        kh, kw, ci, co = w.shape
        wt = jnp.transpose(w, (3, 0, 1, 2))                       # (co, kh, kw, ci)
        wt = jnp.pad(wt, ((0, co_pad - co), (0, 0), (0, 0), (0, ci_pad - ci)))
        return wt.reshape(co_pad, kh * kw * ci_pad).astype(f32)

    w1s = weight_slab(w1, Cmid_p, Cin_p)      # (24, 72)
    w2s = weight_slab(w2, Cout_p, Cmid_p)     # (8, 216)
    # TODO(synk): for large channel counts cast the tap stack + weight slabs to bf16
    # (f32 accumulation) to halve DMA/VMEM bytes; keep GroupNorm statistics in f32.

    # GroupNorm affine params as (C_p, 1) columns; padded channels get gamma=beta=0.
    def col(p, c_real, c_pad):
        return jnp.pad(p.reshape(c_real), (0, c_pad - c_real)).reshape(c_pad, 1).astype(f32)

    g1c, b1c = col(g1, Cmid, Cmid_p), col(b1, Cmid, Cmid_p)
    g2c, b2c = col(g2, Cout, Cout_p), col(b2, Cout, Cout_p)
    g3c, b3c = col(g3, Cout, Cout_p), col(b3, Cout, Cout_p)

    # Same-group indicator matrices, pre-scaled by 1/(valid elements per group).
    def group_combine(c_real, c_pad, groups):
        cpg = c_real // groups
        idx = jnp.arange(c_pad)
        gi = idx // cpg
        valid = idx < c_real
        same = (gi[:, None] == gi[None, :]) & valid[:, None] & valid[None, :]
        return same.astype(f32) / float(hw * cpg)

    a1 = group_combine(Cmid, Cmid_p, NUM_GROUPS)     # (24, 24), scaled 1/(hw*5)
    a2 = group_combine(Cout, Cout_p, NUM_GROUPS)     # (8, 8),   scaled 1/(hw*1)

    # Interior mask over the flattened padded plane (1.0 at the real HxW positions).
    q = jnp.arange(Ppad)
    yy, xx = q // Wp, q % Wp
    mask = ((q < P) & (yy >= 1) & (yy <= H) & (xx >= 1) & (xx <= W))
    mask = mask.astype(f32).reshape(1, Ppad)

    kernel = functools.partial(basic_block_kernel, Wp, Ppad)

    out_flat = pl.pallas_call(
        kernel,
        out_shape=jax.ShapeDtypeStruct((N, Cout_p, Ppad), f32),
        grid_spec=pltpu.PrefetchScalarGridSpec(
            num_scalar_prefetch=0,
            grid=(N,),
            in_specs=[
                pl.BlockSpec((1, Cin_p, Ppad), lambda n: (n, 0, 0)),
                pl.BlockSpec((Cmid_p, 9 * Cin_p), lambda n: (0, 0)),
                pl.BlockSpec((Cout_p, 9 * Cmid_p), lambda n: (0, 0)),
                pl.BlockSpec((Cmid_p, Cmid_p), lambda n: (0, 0)),
                pl.BlockSpec((Cout_p, Cout_p), lambda n: (0, 0)),
                pl.BlockSpec((Cmid_p, 1), lambda n: (0, 0)),
                pl.BlockSpec((Cmid_p, 1), lambda n: (0, 0)),
                pl.BlockSpec((Cout_p, 1), lambda n: (0, 0)),
                pl.BlockSpec((Cout_p, 1), lambda n: (0, 0)),
                pl.BlockSpec((Cout_p, 1), lambda n: (0, 0)),
                pl.BlockSpec((Cout_p, 1), lambda n: (0, 0)),
                pl.BlockSpec((1, Ppad), lambda n: (0, 0)),
            ],
            out_specs=pl.BlockSpec((1, Cout_p, Ppad), lambda n: (n, 0, 0)),
        ),
        # Batch axis is embarrassingly parallel -> v7x shards it over its 2 TCs.
        compiler_params=pltpu.CompilerParams(dimension_semantics=("parallel",)),
    )(xp, w1s, w2s, a1, a2, g1c, b1c, g2c, b2c, g3c, b3c, mask)

    # TODO(synk): on single-TC v5e/v6e fold the batch onto the lane axis (one grid
    # step, lanes = N*Ppad with per-sample GN segments), gated on chip generation
    # via pltpu.get_tpu_info(); and for production resolutions (H,W >= 112) tile
    # the plane into row bands with a 1-row halo + vmem_limit_bytes sized for
    # v7x's 64 MiB VMEM.
    out = out_flat[:, :Cout, :P].reshape(N, Cout, Hp, Wp)[:, :, 1:H + 1, 1:W + 1]
    return out


def reference_forward(x_nchw, params):
    """Pure-JAX reference (XLA conv / reductions) for correctness checking."""
    w1, g1, b1, w2, g2, b2, g3, b3 = params
    x = jnp.transpose(x_nchw, (0, 2, 3, 1))

    def conv(xv, w):
        return jax.lax.conv_general_dilated(
            xv, w, (1, 1), "SAME",
            dimension_numbers=("NHWC", "HWIO", "NHWC"))

    def gn(y, gamma, beta, G, eps=GN_EPS):
        N, H, W, C = y.shape
        cpg = C // G
        yr = y.reshape(N, H, W, G, cpg)
        mu = yr.mean(axis=(1, 2, 4), keepdims=True)
        var = ((yr - mu) ** 2).mean(axis=(1, 2, 4), keepdims=True)
        yn = ((yr - mu) * jax.lax.rsqrt(var + eps)).reshape(N, H, W, C)
        return yn * gamma[0] + beta[0]

    out = conv(x, w1)
    out = jnp.maximum(gn(out, g1, b1, NUM_GROUPS), 0.0)
    out = conv(out, w2)                       # dropout p=0, injection=0
    out = gn(out, g2, b2, NUM_GROUPS)
    out = out + x
    out = jnp.maximum(out, 0.0)
    out = gn(out, g3, b3, NUM_GROUPS)
    return jnp.transpose(out, (0, 3, 1, 2))


if __name__ == "__main__":
    # BasicBlock(inplanes=4, planes=4): conv1 is 4 -> 20 (= DEQ_EXPAND*planes),
    # conv2 is 20 -> 4; residual requires inplanes == planes.
    N, Cin, H, W = 2, 4, 16, 16
    planes = 4
    Cmid = DEQ_EXPAND * planes
    Cout = planes

    key = jax.random.PRNGKey(0)
    keys = jax.random.split(key, 10)

    x = jax.random.normal(keys[0], (N, Cin, H, W), jnp.float32)
    # Conv weights in HWIO layout (= PyTorch OIHW transposed to (kh, kw, in, out)).
    w1 = 0.2 * jax.random.normal(keys[1], (3, 3, Cin, Cmid), jnp.float32)
    w2 = 0.2 * jax.random.normal(keys[2], (3, 3, Cmid, Cout), jnp.float32)
    g1 = 1.0 + 0.1 * jax.random.normal(keys[3], (1, Cmid), jnp.float32)
    b1 = 0.1 * jax.random.normal(keys[4], (1, Cmid), jnp.float32)
    g2 = 1.0 + 0.1 * jax.random.normal(keys[5], (1, Cout), jnp.float32)
    b2 = 0.1 * jax.random.normal(keys[6], (1, Cout), jnp.float32)
    g3 = 1.0 + 0.1 * jax.random.normal(keys[7], (1, Cout), jnp.float32)
    b3 = 0.1 * jax.random.normal(keys[8], (1, Cout), jnp.float32)

    params = (w1, g1, b1, w2, g2, b2, g3, b3)

    out = basic_block_forward(x, params)
    out = jax.block_until_ready(out)

    ref = jax.block_until_ready(reference_forward(x, params))
    assert out.shape == (N, Cout, H, W), out.shape
    assert jnp.allclose(out, ref, atol=1e-3, rtol=1e-3), float(
        jnp.max(jnp.abs(out - ref)))

    print("KERNEL_OK")
</pallas_src>

<mosaic_0001>
module attributes {stable_mosaic.version = 11 : i64} {
  func.func @basic_block_kernel(%arg0: i32, %arg1: memref<1x8x384xf32, #tpu.memory_space<vmem>>, %arg2: memref<24x72xf32, #tpu.memory_space<vmem>>, %arg3: memref<8x216xf32, #tpu.memory_space<vmem>>, %arg4: memref<24x24xf32, #tpu.memory_space<vmem>>, %arg5: memref<8x8xf32, #tpu.memory_space<vmem>>, %arg6: memref<24x1xf32, #tpu.memory_space<vmem>>, %arg7: memref<24x1xf32, #tpu.memory_space<vmem>>, %arg8: memref<8x1xf32, #tpu.memory_space<vmem>>, %arg9: memref<8x1xf32, #tpu.memory_space<vmem>>, %arg10: memref<8x1xf32, #tpu.memory_space<vmem>>, %arg11: memref<8x1xf32, #tpu.memory_space<vmem>>, %arg12: memref<1x384xf32, #tpu.memory_space<vmem>>, %arg13: memref<1x8x384xf32, #tpu.memory_space<vmem>>) attributes {dimension_semantics = [#tpu.dimension_semantics<parallel>], iteration_bounds = array<i64: 2>, scalar_prefetch = 0 : i64, scratch_operands = 0 : i64, tpu.core_type = #tpu.core_type<tc>, window_params = [{transform_indices = @transform_0, window_bounds = array<i64: 1, 8, 384>}, {pipeline_mode = #tpu.pipeline_mode<synchronous>, transform_indices = @transform_1, window_bounds = array<i64: 24, 72>}, {pipeline_mode = #tpu.pipeline_mode<synchronous>, transform_indices = @transform_2, window_bounds = array<i64: 8, 216>}, {pipeline_mode = #tpu.pipeline_mode<synchronous>, transform_indices = @transform_3, window_bounds = array<i64: 24, 24>}, {pipeline_mode = #tpu.pipeline_mode<synchronous>, transform_indices = @transform_4, window_bounds = array<i64: 8, 8>}, {pipeline_mode = #tpu.pipeline_mode<synchronous>, transform_indices = @transform_5, window_bounds = array<i64: 24, 1>}, {pipeline_mode = #tpu.pipeline_mode<synchronous>, transform_indices = @transform_6, window_bounds = array<i64: 24, 1>}, {pipeline_mode = #tpu.pipeline_mode<synchronous>, transform_indices = @transform_7, window_bounds = array<i64: 8, 1>}, {pipeline_mode = #tpu.pipeline_mode<synchronous>, transform_indices = @transform_8, window_bounds = array<i64: 8, 1>}, {pipeline_mode = #tpu.pipeline_mode<synchronous>, transform_indices = @transform_9, window_bounds = array<i64: 8, 1>}, {pipeline_mode = #tpu.pipeline_mode<synchronous>, transform_indices = @transform_10, window_bounds = array<i64: 8, 1>}, {pipeline_mode = #tpu.pipeline_mode<synchronous>, transform_indices = @transform_11, window_bounds = array<i64: 1, 384>}, {transform_indices = @transform_12, window_bounds = array<i64: 1, 8, 384>}]} {
    %c0 = arith.constant 0 : index
    %c0_0 = arith.constant 0 : index
    %c0_1 = arith.constant 0 : index
    %0 = vector.load %arg1[%c0, %c0_0, %c0_1] : memref<1x8x384xf32, #tpu.memory_space<vmem>>, vector<1x8x384xf32>
    %1 = vector.shape_cast %0 : vector<1x8x384xf32> to vector<8x384xf32>
    %c0_2 = arith.constant 0 : index
    %c0_3 = arith.constant 0 : index
    %2 = vector.load %arg12[%c0_2, %c0_3] : memref<1x384xf32, #tpu.memory_space<vmem>>, vector<1x384xf32>
    %c0_4 = arith.constant 0 : index
    %c0_5 = arith.constant 0 : index
    %3 = vector.load %arg4[%c0_4, %c0_5] : memref<24x24xf32, #tpu.memory_space<vmem>>, vector<24x24xf32>
    %c0_6 = arith.constant 0 : index
    %c0_7 = arith.constant 0 : index
    %4 = vector.load %arg5[%c0_6, %c0_7] : memref<8x8xf32, #tpu.memory_space<vmem>>, vector<8x8xf32>
    %c0_8 = arith.constant 0 : index
    %c0_9 = arith.constant 0 : index
    %5 = vector.load %arg2[%c0_8, %c0_9] : memref<24x72xf32, #tpu.memory_space<vmem>>, vector<24x72xf32>
    %c19_i32 = arith.constant 19 : i32
    %6 = tpu.dynamic_rotate %1 by %c19_i32 dim 1 : vector<8x384xf32>, i32 -> vector<8x384xf32>
    %c18_i32 = arith.constant 18 : i32
    %7 = tpu.dynamic_rotate %1 by %c18_i32 dim 1 : vector<8x384xf32>, i32 -> vector<8x384xf32>
    %c17_i32 = arith.constant 17 : i32
    %8 = tpu.dynamic_rotate %1 by %c17_i32 dim 1 : vector<8x384xf32>, i32 -> vector<8x384xf32>
    %c1_i32 = arith.constant 1 : i32
    %9 = tpu.dynamic_rotate %1 by %c1_i32 dim 1 : vector<8x384xf32>, i32 -> vector<8x384xf32>
    %c383_i32 = arith.constant 383 : i32
    %10 = tpu.dynamic_rotate %1 by %c383_i32 dim 1 : vector<8x384xf32>, i32 -> vector<8x384xf32>
    %c367_i32 = arith.constant 367 : i32
    %11 = tpu.dynamic_rotate %1 by %c367_i32 dim 1 : vector<8x384xf32>, i32 -> vector<8x384xf32>
    %c366_i32 = arith.constant 366 : i32
    %12 = tpu.dynamic_rotate %1 by %c366_i32 dim 1 : vector<8x384xf32>, i32 -> vector<8x384xf32>
    %c365_i32 = arith.constant 365 : i32
    %13 = tpu.dynamic_rotate %1 by %c365_i32 dim 1 : vector<8x384xf32>, i32 -> vector<8x384xf32>
    %14 = tpu.concatenate %6, %7, %8, %9, %1, %10, %11, %12, %13 in 0 : vector<8x384xf32>, vector<8x384xf32>, vector<8x384xf32>, vector<8x384xf32>, vector<8x384xf32>, vector<8x384xf32>, vector<8x384xf32>, vector<8x384xf32>, vector<8x384xf32> -> vector<72x384xf32>
    %cst = arith.constant dense<0.000000e+00> : vector<24x384xf32>
    %15 = tpu.matmul %5, %14, %cst {dimension_numbers = #tpu.dot_dimension_numbers<[1], [0], [0], [1], [0, 0, 1, 1], [], []>} : vector<24x72xf32>, vector<72x384xf32>, vector<24x384xf32> -> vector<24x384xf32>
    %16 = vector.broadcast %2 : vector<1x384xf32> to vector<24x384xf32>
    %17 = arith.mulf %15, %16 : vector<24x384xf32>
    %c0_10 = arith.constant 0 : index
    %c0_11 = arith.constant 0 : index
    %18 = vector.load %arg6[%c0_10, %c0_11] : memref<24x1xf32, #tpu.memory_space<vmem>>, vector<24x1xf32>
    %c0_12 = arith.constant 0 : index
    %c0_13 = arith.constant 0 : index
    %19 = vector.load %arg7[%c0_12, %c0_13] : memref<24x1xf32, #tpu.memory_space<vmem>>, vector<24x1xf32>
    %cst_14 = arith.constant dense<0.000000e+00> : vector<24xf32>
    %20 = vector.multi_reduction <add>, %17, %cst_14 [1] : vector<24x384xf32> to vector<24xf32>
    %21 = vector.shape_cast %20 : vector<24xf32> to vector<24x1xf32>
    %22 = arith.mulf %17, %17 : vector<24x384xf32>
    %cst_15 = arith.constant dense<0.000000e+00> : vector<24xf32>
    %23 = vector.multi_reduction <add>, %22, %cst_15 [1] : vector<24x384xf32> to vector<24xf32>
    %24 = vector.shape_cast %23 : vector<24xf32> to vector<24x1xf32>
    %cst_16 = arith.constant dense<0.000000e+00> : vector<24x1xf32>
    %25 = tpu.matmul %3, %21, %cst_16 {dimension_numbers = #tpu.dot_dimension_numbers<[1], [0], [0], [1], [0, 0, 1, 1], [], []>} : vector<24x24xf32>, vector<24x1xf32>, vector<24x1xf32> -> vector<24x1xf32>
    %cst_17 = arith.constant dense<0.000000e+00> : vector<24x1xf32>
    %26 = tpu.matmul %3, %24, %cst_17 {dimension_numbers = #tpu.dot_dimension_numbers<[1], [0], [0], [1], [0, 0, 1, 1], [], []>} : vector<24x24xf32>, vector<24x1xf32>, vector<24x1xf32> -> vector<24x1xf32>
    %27 = arith.mulf %25, %25 : vector<24x1xf32>
    %28 = arith.subf %26, %27 : vector<24x1xf32>
    %cst_18 = arith.constant 9.99999974E-6 : f32
    %29 = vector.broadcast %cst_18 : f32 to vector<24x1xf32>
    %30 = arith.addf %28, %29 : vector<24x1xf32>
    %31 = math.rsqrt %30 : vector<24x1xf32>
    %32 = vector.broadcast %25 : vector<24x1xf32> to vector<24x384xf32>
    %33 = arith.subf %17, %32 : vector<24x384xf32>
    %34 = arith.mulf %31, %18 : vector<24x1xf32>
    %35 = vector.broadcast %34 : vector<24x1xf32> to vector<24x384xf32>
    %36 = arith.mulf %33, %35 : vector<24x384xf32>
    %37 = vector.broadcast %19 : vector<24x1xf32> to vector<24x384xf32>
    %38 = arith.addf %36, %37 : vector<24x384xf32>
    %cst_19 = arith.constant 0.000000e+00 : f32
    %39 = vector.broadcast %cst_19 : f32 to vector<24x384xf32>
    %40 = arith.maximumf %38, %39 : vector<24x384xf32>
    %41 = vector.broadcast %2 : vector<1x384xf32> to vector<24x384xf32>
    %42 = arith.mulf %40, %41 : vector<24x384xf32>
    %c0_20 = arith.constant 0 : index
    %c0_21 = arith.constant 0 : index
    %43 = vector.load %arg3[%c0_20, %c0_21] : memref<8x216xf32, #tpu.memory_space<vmem>>, vector<8x216xf32>
    %c19_i32_22 = arith.constant 19 : i32
    %44 = tpu.dynamic_rotate %42 by %c19_i32_22 dim 1 : vector<24x384xf32>, i32 -> vector<24x384xf32>
    %c18_i32_23 = arith.constant 18 : i32
    %45 = tpu.dynamic_rotate %42 by %c18_i32_23 dim 1 : vector<24x384xf32>, i32 -> vector<24x384xf32>
    %c17_i32_24 = arith.constant 17 : i32
    %46 = tpu.dynamic_rotate %42 by %c17_i32_24 dim 1 : vector<24x384xf32>, i32 -> vector<24x384xf32>
    %c1_i32_25 = arith.constant 1 : i32
    %47 = tpu.dynamic_rotate %42 by %c1_i32_25 dim 1 : vector<24x384xf32>, i32 -> vector<24x384xf32>
    %c383_i32_26 = arith.constant 383 : i32
    %48 = tpu.dynamic_rotate %42 by %c383_i32_26 dim 1 : vector<24x384xf32>, i32 -> vector<24x384xf32>
    %c367_i32_27 = arith.constant 367 : i32
    %49 = tpu.dynamic_rotate %42 by %c367_i32_27 dim 1 : vector<24x384xf32>, i32 -> vector<24x384xf32>
    %c366_i32_28 = arith.constant 366 : i32
    %50 = tpu.dynamic_rotate %42 by %c366_i32_28 dim 1 : vector<24x384xf32>, i32 -> vector<24x384xf32>
    %c365_i32_29 = arith.constant 365 : i32
    %51 = tpu.dynamic_rotate %42 by %c365_i32_29 dim 1 : vector<24x384xf32>, i32 -> vector<24x384xf32>
    %52 = tpu.concatenate %44, %45, %46, %47, %42, %48, %49, %50, %51 in 0 : vector<24x384xf32>, vector<24x384xf32>, vector<24x384xf32>, vector<24x384xf32>, vector<24x384xf32>, vector<24x384xf32>, vector<24x384xf32>, vector<24x384xf32>, vector<24x384xf32> -> vector<216x384xf32>
    %cst_30 = arith.constant dense<0.000000e+00> : vector<8x384xf32>
    %53 = tpu.matmul %43, %52, %cst_30 {dimension_numbers = #tpu.dot_dimension_numbers<[1], [0], [0], [1], [0, 0, 1, 1], [], []>} : vector<8x216xf32>, vector<216x384xf32>, vector<8x384xf32> -> vector<8x384xf32>
    %54 = vector.broadcast %2 : vector<1x384xf32> to vector<8x384xf32>
    %55 = arith.mulf %53, %54 : vector<8x384xf32>
    %c0_31 = arith.constant 0 : index
    %c0_32 = arith.constant 0 : index
    %56 = vector.load %arg8[%c0_31, %c0_32] : memref<8x1xf32, #tpu.memory_space<vmem>>, vector<8x1xf32>
    %c0_33 = arith.constant 0 : index
    %c0_34 = arith.constant 0 : index
    %57 = vector.load %arg9[%c0_33, %c0_34] : memref<8x1xf32, #tpu.memory_space<vmem>>, vector<8x1xf32>
    %cst_35 = arith.constant dense<0.000000e+00> : vector<8xf32>
    %58 = vector.multi_reduction <add>, %55, %cst_35 [1] : vector<8x384xf32> to vector<8xf32>
    %59 = vector.shape_cast %58 : vector<8xf32> to vector<8x1xf32>
    %60 = arith.mulf %55, %55 : vector<8x384xf32>
    %cst_36 = arith.constant dense<0.000000e+00> : vector<8xf32>
    %61 = vector.multi_reduction <add>, %60, %cst_36 [1] : vector<8x384xf32> to vector<8xf32>
    %62 = vector.shape_cast %61 : vector<8xf32> to vector<8x1xf32>
    %cst_37 = arith.constant dense<0.000000e+00> : vector<8x1xf32>
    %63 = tpu.matmul %4, %59, %cst_37 {dimension_numbers = #tpu.dot_dimension_numbers<[1], [0], [0], [1], [0, 0, 1, 1], [], []>} : vector<8x8xf32>, vector<8x1xf32>, vector<8x1xf32> -> vector<8x1xf32>
    %cst_38 = arith.constant dense<0.000000e+00> : vector<8x1xf32>
    %64 = tpu.matmul %4, %62, %cst_38 {dimension_numbers = #tpu.dot_dimension_numbers<[1], [0], [0], [1], [0, 0, 1, 1], [], []>} : vector<8x8xf32>, vector<8x1xf32>, vector<8x1xf32> -> vector<8x1xf32>
    %65 = arith.mulf %63, %63 : vector<8x1xf32>
    %66 = arith.subf %64, %65 : vector<8x1xf32>
    %cst_39 = arith.constant 9.99999974E-6 : f32
    %67 = vector.broadcast %cst_39 : f32 to vector<8x1xf32>
    %68 = arith.addf %66, %67 : vector<8x1xf32>
    %69 = math.rsqrt %68 : vector<8x1xf32>
    %70 = vector.broadcast %63 : vector<8x1xf32> to vector<8x384xf32>
    %71 = arith.subf %55, %70 : vector<8x384xf32>
    %72 = arith.mulf %69, %56 : vector<8x1xf32>
    %73 = vector.broadcast %72 : vector<8x1xf32> to vector<8x384xf32>
    %74 = arith.mulf %71, %73 : vector<8x384xf32>
    %75 = vector.broadcast %57 : vector<8x1xf32> to vector<8x384xf32>
    %76 = arith.addf %74, %75 : vector<8x384xf32>
    %77 = arith.addf %76, %1 : vector<8x384xf32>
    %cst_40 = arith.constant 0.000000e+00 : f32
    %78 = vector.broadcast %cst_40 : f32 to vector<8x384xf32>
    %79 = arith.maximumf %77, %78 : vector<8x384xf32>
    %80 = vector.broadcast %2 : vector<1x384xf32> to vector<8x384xf32>
    %81 = arith.mulf %79, %80 : vector<8x384xf32>
    %c0_41 = arith.constant 0 : index
    %c0_42 = arith.constant 0 : index
    %82 = vector.load %arg10[%c0_41, %c0_42] : memref<8x1xf32, #tpu.memory_space<vmem>>, vector<8x1xf32>
    %c0_43 = arith.constant 0 : index
    %c0_44 = arith.constant 0 : index
    %83 = vector.load %arg11[%c0_43, %c0_44] : memref<8x1xf32, #tpu.memory_space<vmem>>, vector<8x1xf32>
    %cst_45 = arith.constant dense<0.000000e+00> : vector<8xf32>
    %84 = vector.multi_reduction <add>, %81, %cst_45 [1] : vector<8x384xf32> to vector<8xf32>
    %85 = vector.shape_cast %84 : vector<8xf32> to vector<8x1xf32>
    %86 = arith.mulf %81, %81 : vector<8x384xf32>
    %cst_46 = arith.constant dense<0.000000e+00> : vector<8xf32>
    %87 = vector.multi_reduction <add>, %86, %cst_46 [1] : vector<8x384xf32> to vector<8xf32>
    %88 = vector.shape_cast %87 : vector<8xf32> to vector<8x1xf32>
    %cst_47 = arith.constant dense<0.000000e+00> : vector<8x1xf32>
    %89 = tpu.matmul %4, %85, %cst_47 {dimension_numbers = #tpu.dot_dimension_numbers<[1], [0], [0], [1], [0, 0, 1, 1], [], []>} : vector<8x8xf32>, vector<8x1xf32>, vector<8x1xf32> -> vector<8x1xf32>
    %cst_48 = arith.constant dense<0.000000e+00> : vector<8x1xf32>
    %90 = tpu.matmul %4, %88, %cst_48 {dimension_numbers = #tpu.dot_dimension_numbers<[1], [0], [0], [1], [0, 0, 1, 1], [], []>} : vector<8x8xf32>, vector<8x1xf32>, vector<8x1xf32> -> vector<8x1xf32>
    %91 = arith.mulf %89, %89 : vector<8x1xf32>
    %92 = arith.subf %90, %91 : vector<8x1xf32>
    %cst_49 = arith.constant 9.99999974E-6 : f32
    %93 = vector.broadcast %cst_49 : f32 to vector<8x1xf32>
    %94 = arith.addf %92, %93 : vector<8x1xf32>
    %95 = math.rsqrt %94 : vector<8x1xf32>
    %96 = vector.broadcast %89 : vector<8x1xf32> to vector<8x384xf32>
    %97 = arith.subf %81, %96 : vector<8x384xf32>
    %98 = arith.mulf %95, %82 : vector<8x1xf32>
    %99 = vector.broadcast %98 : vector<8x1xf32> to vector<8x384xf32>
    %100 = arith.mulf %97, %99 : vector<8x384xf32>
    %101 = vector.broadcast %83 : vector<8x1xf32> to vector<8x384xf32>
    %102 = arith.addf %100, %101 : vector<8x384xf32>
    %c0_50 = arith.constant 0 : index
    %c0_51 = arith.constant 0 : index
    %c0_52 = arith.constant 0 : index
    %103 = vector.load %arg13[%c0_50, %c0_51, %c0_52] : memref<1x8x384xf32, #tpu.memory_space<vmem>>, vector<1x8x384xf32>
    %104 = vector.shape_cast %103 : vector<1x8x384xf32> to vector<8x384xf32>
    %105 = vector.shape_cast %102 : vector<8x384xf32> to vector<1x8x384xf32>
    tpu.vector_store %arg13[%c0_50, %c0_51, %c0_52], %105 {strides = array<i32>} : memref<1x8x384xf32, #tpu.memory_space<vmem>>, vector<1x8x384xf32>,
    return
  }
  func.func @transform_0(%arg0: i32) -> (i32, i32, i32) {
    %c0_i32 = arith.constant 0 : i32
    %c0_i32_0 = arith.constant 0 : i32
    %c0_i32_1 = arith.constant 0 : i32
    return %arg0, %c0_i32, %c0_i32_0 : i32, i32, i32
  }
  func.func @transform_1(%arg0: i32) -> (i32, i32) {
    %c0_i32 = arith.constant 0 : i32
    %c0_i32_0 = arith.constant 0 : i32
    %c0_i32_1 = arith.constant 0 : i32
    return %c0_i32, %c0_i32_0 : i32, i32
  }
  func.func @transform_2(%arg0: i32) -> (i32, i32) {
    %c0_i32 = arith.constant 0 : i32
    %c0_i32_0 = arith.constant 0 : i32
    %c0_i32_1 = arith.constant 0 : i32
    return %c0_i32, %c0_i32_0 : i32, i32
  }
  func.func @transform_3(%arg0: i32) -> (i32, i32) {
    %c0_i32 = arith.constant 0 : i32
    %c0_i32_0 = arith.constant 0 : i32
    %c0_i32_1 = arith.constant 0 : i32
    return %c0_i32, %c0_i32_0 : i32, i32
  }
  func.func @transform_4(%arg0: i32) -> (i32, i32) {
    %c0_i32 = arith.constant 0 : i32
    %c0_i32_0 = arith.constant 0 : i32
    %c0_i32_1 = arith.constant 0 : i32
    return %c0_i32, %c0_i32_0 : i32, i32
  }
  func.func @transform_5(%arg0: i32) -> (i32, i32) {
    %c0_i32 = arith.constant 0 : i32
    %c0_i32_0 = arith.constant 0 : i32
    %c0_i32_1 = arith.constant 0 : i32
    return %c0_i32, %c0_i32_0 : i32, i32
  }
  func.func @transform_6(%arg0: i32) -> (i32, i32) {
    %c0_i32 = arith.constant 0 : i32
    %c0_i32_0 = arith.constant 0 : i32
    %c0_i32_1 = arith.constant 0 : i32
    return %c0_i32, %c0_i32_0 : i32, i32
  }
  func.func @transform_7(%arg0: i32) -> (i32, i32) {
    %c0_i32 = arith.constant 0 : i32
    %c0_i32_0 = arith.constant 0 : i32
    %c0_i32_1 = arith.constant 0 : i32
    return %c0_i32, %c0_i32_0 : i32, i32
  }
  func.func @transform_8(%arg0: i32) -> (i32, i32) {
    %c0_i32 = arith.constant 0 : i32
    %c0_i32_0 = arith.constant 0 : i32
    %c0_i32_1 = arith.constant 0 : i32
    return %c0_i32, %c0_i32_0 : i32, i32
  }
  func.func @transform_9(%arg0: i32) -> (i32, i32) {
    %c0_i32 = arith.constant 0 : i32
    %c0_i32_0 = arith.constant 0 : i32
    %c0_i32_1 = arith.constant 0 : i32
    return %c0_i32, %c0_i32_0 : i32, i32
  }
  func.func @transform_10(%arg0: i32) -> (i32, i32) {
    %c0_i32 = arith.constant 0 : i32
    %c0_i32_0 = arith.constant 0 : i32
    %c0_i32_1 = arith.constant 0 : i32
    return %c0_i32, %c0_i32_0 : i32, i32
  }
  func.func @transform_11(%arg0: i32) -> (i32, i32) {
    %c0_i32 = arith.constant 0 : i32
    %c0_i32_0 = arith.constant 0 : i32
    %c0_i32_1 = arith.constant 0 : i32
    return %c0_i32, %c0_i32_0 : i32, i32
  }
  func.func @transform_12(%arg0: i32) -> (i32, i32, i32) {
    %c0_i32 = arith.constant 0 : i32
    %c0_i32_0 = arith.constant 0 : i32
    %c0_i32_1 = arith.constant 0 : i32
    return %arg0, %c0_i32, %c0_i32_0 : i32, i32, i32
  }
}

</mosaic_0001>

<bundles_post_ra>
// kernel: tpu_custom_call.1
= control target key start
LH: loop header
LB: loop body
LE: loop exit
PB: predicated region body
PF: predicated region fallthrough
CT: control target
= control target key end

     0   :  { %17 = vsyncpa [#allocation3], 0  ;;  %s3413_s0 = inlined_call_operand.vmem [shape: f32[2,8,384], index: 0, kind: input, shape index: {}]   ;;  %s3414_s1 = inlined_call_operand.vmem [shape: f32[24,72], index: 1, kind: input, shape index: {}]   ;;  %s3415_s2 = inlined_call_operand.hbm [shape: f32[8,216], index: 2, kind: input, shape index: {}]   ;;  %s3416_s3 = inlined_call_operand.vmem [shape: f32[24,24], index: 3, kind: input, shape index: {}]   ;;  %s3417_s4 = inlined_call_operand.hbm [shape: f32[8,8], index: 4, kind: input, shape index: {}]   ;;  %s3418_s5 = inlined_call_operand.vmem [shape: f32[24,1], index: 5, kind: input, shape index: {}]   ;;  %s3419_s6 = inlined_call_operand.vmem [shape: f32[24,1], index: 6, kind: input, shape index: {}]   ;;  %s3420_s7 = inlined_call_operand.vmem [shape: f32[8,1], index: 7, kind: input, shape index: {}]   ;;  %s3421_s8 = inlined_call_operand.vmem [shape: f32[8,1], index: 8, kind: input, shape index: {}]   ;;  %s3422_s9 = inlined_call_operand.vmem [shape: f32[8,1], index: 9, kind: input, shape index: {}]   ;;  %s3423_s10 = inlined_call_operand.vmem [shape: f32[8,1], index: 10, kind: input, shape index: {}]   ;;  %s3424_s11 = inlined_call_operand.vmem [shape: f32[1,384], index: 11, kind: input, shape index: {}]   ;;  %s3425_s12 = inlined_call_operand.hbm [shape: f32[2,8,384], index: 12, kind: output, shape index: {}]  }
   0x1   :  { %18 = vsyncpa [#allocation6], 0 }
   0x2   :  { %19 = vsyncpa [#allocation4], 0 }
   0x3   :  { %21 = vsyncpa [#allocation4 + $0x1], 0  ;;  %s2637_s21 = smov 0   ;;  %s2639_s22 = smov 0  }
   0x4   :  { %s2641_s23 = smov 0   ;;  %s2643_s24 = smov 0  }
   0x5 LB: > { %3439 = sst [smem:[#allocation11_spill]] %s2551_s23  ;;  %s2658_s25 = sadd.s32 4294967295, %s2555_s24   ;;  %s2555_s24 = sphi %s2643_s24, %s3458_s24   ;;  %s2551_s23 = sphi %s2641_s23, %s3460_s23   ;;  %s2547_s22 = sphi %s2639_s22, %s3462_s22   ;;  %s2543_s21 = sphi %s2637_s21, %s3461_s21  }
   0x6   : > { %s1885_s26 = sadd.s32 4294967294, %s2555_s24   ;;  %s2662_s27 = sadd.s32 1, %s2555_s24  }
   0x7   : > { %3440 = sst [smem:[#allocation12_spill]] %s2662_s27  ;;  %s291_s28 = sadd.s32 1, %s2551_s23 }
   0x8   : > { %s288_s29 = ssub.s32 %s2555_s24, %s2662_s27  ;;  %p301_p0 = scmp.ne.s32.totalorder %s2551_s23, %s2547_s22 }
   0x9   : > { %p289_p1 = scmp.eq.s32.totalorder %s288_s29, 0  ;;  %p302_p2 = scmp.eq.s32.totalorder %s2658_s25, 1 }
   0xa   : > { %p307_p3 = scmp.ne.s32.totalorder %s2547_s22, %s2543_s21  ;;  %p308_p4 = scmp.eq.s32.totalorder %s1885_s26, 1 }
   0xb   : > { %s2673_s30 = scalar_select %p289_p1, %s2551_s23, %s291_s28  }
   0xc   : > { %p2675_p5 = por %p302_p2, %p301_p0  ;;  %p2679_p6 = por %p308_p4, %p307_p3 }
   0xd   : > { %3441 = sst [smem:[#allocation13_spill]] %s2673_s30  ;;  %p1886_p7 = scmp.ge.s32.totalorder %s2555_s24, 1 }
   0xe   : > { %s3442_s13 = scalar_select %p2675_p5, 1, 0 }
   0xf   : > { %s3443_s14 = scalar_select %p2679_p6, 1, 0 }
  0x10   : > { %p315_p8 = scmp.lt.s32.totalorder %s2555_s24, 3  ;;  %p3429_p9 = scmp.eq.s32.totalorder %s2658_s25, 0 }
  0x11   : > { %3444 = sst [smem:[#allocation14_spill]] %s3443_s14  ;;  %s2557_s16 = smov [#allocation2]  }
  0x12   : > { %p2686_p10 = pnand %p1886_p7, %p315_p8  ;;  %s331_s17 = sshll.u32 %s2557_s16, 4  ;;  %s332_s17 = int_to_ptr.vmem [resolvable:$true] %s331_s17 }
  0x13   : > { %s2558_s18 = smov [#allocation5]   ;;  %s2429_s29 = scalar_lea.hbm %s3415_s2, 256 }
  0x14   : > { %s3445_s15 = scalar_select %p2686_p10, 1, 0 }
  0x15   : > { %p2162_p11 = pneg %p2686_p10  ;;  %s345_s19 = sshll.u32 %s2558_s18, 4  ;;  %s2698_s19 = int_to_ptr.vmem [resolvable:$true] %s345_s19 }
  0x16   : > { %p2430_p13 = scmp.ne.s32.totalorder %s3415_s2, %s2429_s29  ;;  %p2436_p3 = scmp.lt.u32.totalorder %s2429_s29, %s3415_s2 }
  0x17   : > { %p2694_p12 = pnand %p3429_p9, %p2162_p11 }
  0x19   : > { %p2431_p0 = pneg %p2694_p12 }
  0x1b   : > { %p2432_p1 = pnand %p2431_p0, %p2430_p13 }
  0x1d   : > { %p2433_p2 = pneg %p2432_p1 }
  0x1f   : > { %p2438_p4 = pnand %p2436_p3, %p2433_p2 }
  0x21   : > { %2441 = shalt.err (!%p2438_p4)
}
  0x22   : > { %s2442_s27 = scalar_lea.vmem %s332_s17, 256  ;;  %p2450_p9 = scmp.lt.s32.totalorder %s332_s17, %s332_s17 }
  0x23   : > { %p2443_p7 = scmp.ne.s32.totalorder %s332_s17, %s2442_s27  ;;  %p2451_p6 = scmp.lt.s32.totalorder %s2442_s27, %s2442_s27 }
  0x25   : > { %p2445_p8 = pnand %p2443_p7, %p2431_p0  ;;  %p2452_p5 = por %p2451_p6, %p2450_p9 }
  0x27   : > { %p2446_p11 = pneg %p2445_p8 }
  0x29   : > { %p2453_p10 = pnand %p2452_p5, %p2446_p11 }
  0x2b   : > { %2456 = shalt.err (!%p2453_p10)
}
  0x2c   : > { %2165 = dma.hbm_to_vmem [thread:$0]  (!%p2694_p12), %s3415_s2, 256, %s332_s17, [#allocation3]  }
  0x2d   : > { %s2457_s29 = scalar_lea.hbm %s3417_s4, 128 }
  0x2e   : > { %p2458_p13 = scmp.ne.s32.totalorder %s3417_s4, %s2457_s29  ;;  %p2464_p9 = scmp.lt.u32.totalorder %s2457_s29, %s3417_s4 }
  0x30   : > { %p2460_p6 = pnand %p2458_p13, %p2431_p0 }
  0x32   : > { %p2461_p5 = pneg %p2460_p6 }
  0x34   : > { %p2466_p10 = pnand %p2464_p9, %p2461_p5 }
  0x36   : > { %2469 = shalt.err (!%p2466_p10)
}
  0x37   : > { %s2470_s17 = scalar_lea.vmem %s2698_s19, 128  ;;  %p2478_p4 = scmp.lt.s32.totalorder %s2698_s19, %s2698_s19 }
  0x38   : > { %p2471_p1 = scmp.ne.s32.totalorder %s2698_s19, %s2470_s17  ;;  %p2479_p7 = scmp.lt.s32.totalorder %s2470_s17, %s2470_s17 }
  0x3a   : > { %p2473_p2 = pnand %p2471_p1, %p2431_p0  ;;  %p2480_p8 = por %p2479_p7, %p2478_p4 }
  0x3c   : > { %p2474_p3 = pneg %p2473_p2 }
  0x3e   : > { %p2481_p11 = pnand %p2480_p8, %p2474_p3 }
  0x40   : > { %2484 = shalt.err (!%p2481_p11)
}
  0x41   : > { %2168 = dma.hbm_to_vmem [thread:$0]  (!%p2694_p12), %s3417_s4, 128, %s2698_s19, [#allocation6]  }
  0x42   : > { %p3447_p13 = scmp.ne.s32.totalorder %s3445_s15, 0 }
  0x43   : > { %p3448_p6 = scmp.eq.s32.totalorder (!%p3447_p13), %s2658_s25, 0 }
  0x44   : > { %387 = sbr.rel (%p3447_p13) target bundleno = 2441 (0x989), region = 68 }
  0x4b   : > { %2530 = dma.done.wait (%p3448_p6), [#allocation3], 256   ;;  %p3449_p0 = pmov %p3448_p6 }
  0x4d   : > { %2532 = vsyncadd (%p3449_p0), [#allocation3], 4294967040  ;;  %p3450_p5 = pmov %p3449_p0 }
  0x4e   : > { %p3451_p9 = pmov %p3449_p0 }
  0x4f   : > { %2534 = dma.done.wait (%p3450_p5), [#allocation6], 128  }
  0x50   : > { %2536 = vsyncadd (%p3451_p9), [#allocation6], 4294967168  ;;  %p433_p10 = scmp.lt.s32.totalorder %s2658_s25, 1  ;;  %v2559_v0 = vmov 0.0|0.0   ;;  %s2560_s28 = smov 19   ;;  %v2566_v6 = vmov 0.0   ;;  %v455_v7 = vlaneseq }
  0x51   : > { %2040 = vmatprep.subr.bf16.mxu1 %v2559_v0  ;;  %s2561_s29 = smov 18   ;;  %s2562_s16 = smov 1   ;;  %605 = vmatprep.mubr.f32.mxu0 %v2566_v6  ;;  %vm2568_vm0 = vmmov 0   ;;  %vm531_vm9 = vcmask 588800   ;;  %vm768_vm10 = vcmask 195584   ;;  %vm1261_vm11 = vcmask 719872  }
  0x52   : > { %s434_s20 = scalar_select %p433_p10, %s2658_s25, 1  ;;  %1965 = vmatprep.mubr.msk.f32.mxu1 %vm2568_vm0, %v2566_v6  ;;  %v2809_v9 = vand.u32 127, %v455_v7  ;;  %vm1422_vm12 = vcmask 64512  }
  0x53   : > { %s2563_s18 = smov 17   ;;  %s2564_s27 = smov 127  }
  0x54   : > { %s2150_s19 = smul.u32 24, %s434_s20  ;;  %s3435_s17 = smov 110   ;;  %vm457_vm1 = vcmp.lt.s32.totalorder %v2809_v9, 19  ;;  %vm467_vm2 = vcmp.lt.s32.totalorder %v2809_v9, 18  ;;  %vm487_vm3 = vcmp.lt.s32.totalorder %v2809_v9, 1  ;;  %vm477_vm4 = vcmp.lt.s32.totalorder %v2809_v9, 17 }
  0x55   : > { %s3437_s14 = smov 111   ;;  %s3433_s30 = smov 109   ;;  %vm497_vm5 = vcmp.lt.s32.totalorder %v2809_v9, 127  ;;  %vm517_vm6 = vcmp.lt.s32.totalorder %v2809_v9, 110  ;;  %vm507_vm7 = vcmp.lt.s32.totalorder %v2809_v9, 111  ;;  %vm527_vm8 = vcmp.lt.s32.totalorder %v2809_v9, 109 }
  0x56   : > { %s2763_s23 = scalar_lea.vmem %s3413_s0, %s2150_s19  ;;  %s430_s19 = sand.u32 1, %s2547_s22  }
  0x57   : > { %v2766_v1 = vld [vmem:[%s2763_s23 + $0x10] sm:$0xff]  ;;  %v2769_v2 = vld [vmem:[%s2763_s23] sm:$0xff]  ;;  %v2772_v3 = vld [vmem:[%s2763_s23 + $0x8] sm:$0xff]  ;;  %s2149_s15 = smul.u32 24, %s430_s19  ;;  %p3455_p1 = scmp.ne.s32.totalorder %s3442_s13, 0 }
  0x58   : > { %453 = vrot.lane.b32.xlu1 %v2766_v1, %s2560_s28  ;;  %v2224_v4 = vpack.i.bf16 %v2772_v3, %v2769_v2  ;;  %v2244_v5 = vpack.i.bf16 %v2766_v1, %v2772_v3 }
  0x5a   : > { %2225 = vrot.lane.b32.xlu0 %v2224_v4, %s2560_s28 }
  0x5c   : > { %465 = vrot.lane.b32.xlu1 %v2766_v1, %s2561_s29 }
  0x5e   : > { %2230 = vrot.lane.b32.xlu0 %v2224_v4, %s2561_s29 }
  0x60   : > { %2240 = vrot.lane.b32.xlu1 %v2224_v4, %s2562_s16 }
  0x62   : > { %2235 = vrot.lane.b32.xlu0 %v2224_v4, %s2563_s18 }
  0x64   : > { %485 = vrot.lane.b32.xlu1 %v2766_v1, %s2562_s16 }
  0x66   : > { %475 = vrot.lane.b32.xlu0 %v2766_v1, %s2563_s18 }
  0x68   : > { %491 = vrot.lane.b32.xlu1 %v2769_v2, %s2564_s27 }
  0x6a   : > { %2245 = vrot.lane.b32.xlu0 %v2244_v5, %s2564_s27 }
  0x6c   : > { %2255 = vrot.lane.b32.xlu1 %v2244_v5, %s3435_s17 }
  0x6e   : > { %2250 = vrot.lane.b32.xlu0 %v2244_v5, %s3437_s14 }
  0x70   : > { %511 = vrot.lane.b32.xlu1 %v2769_v2, %s3435_s17  ;;  %s3452_s17 = smov 111  }
  0x72   : > { %501 = vrot.lane.b32.xlu0 %v2769_v2, %s3437_s14 }
  0x74   : > { %525 = vrot.lane.b32.xlu1 %v2766_v1, %s3433_s30 }
  0x76   : > { %523 = vrot.lane.b32.xlu0 %v2772_v3, %s3433_s30 }
  0x7a   : > { %521 = vrot.lane.b32.xlu0 %v2769_v2, %s3433_s30 }
  0xca   : > { %v454_v8 = vpop.permute.xlu1 %453 }
  0xcc   : > { %v2226_v10 = vpop.permute.xlu0 %2225 }
  0xcd   : > { %v2228_v11 = vunpack.i.h.bf16 %v2226_v10  ;;  %v2227_v12 = vunpack.i.l.bf16 %v2226_v10 }
  0xce   : > { %v466_v13 = vpop.permute.xlu1 %465 }
  0xcf   : > { %v459_v18 = vsel %vm457_vm1, %v2227_v12, %v2228_v11  ;;  %v458_v19 = vsel %vm457_vm1, %v2228_v11, %v454_v8  ;;  %v460_v27 = vsel %vm457_vm1, %v454_v8, %v2227_v12 }
  0xd0   : > { %v2231_v14 = vpop.permute.xlu0 %2230 }
  0xd1   : > { %v2233_v15 = vunpack.i.h.bf16 %v2231_v14  ;;  %v2232_v16 = vunpack.i.l.bf16 %v2231_v14  ;;  %v446_v14 = vld [vmem:[%s3414_s1] sm:$0xff] }
  0xd2   : > { %v2241_v17 = vpop.permute.xlu1 %2240 }
  0xd3   : > { %v2243_v20 = vunpack.i.h.bf16 %v2241_v17  ;;  %v2242_v21 = vunpack.i.l.bf16 %v2241_v17  ;;  %v469_v22 = vsel %vm467_vm2, %v2232_v16, %v2233_v15  ;;  %v468_v23 = vsel %vm467_vm2, %v2233_v15, %v466_v13  ;;  %v447_v17 = vld [vmem:[%s3414_s1 + $0x8] sm:$0xff] }
  0xd4   : > { %v2236_v24 = vpop.permute.xlu0 %2235  ;;  %v2024_v25 = vpack.c.bf16 %v469_v22, %v459_v18  ;;  %v2041_v26 = vpack.c.bf16 %v468_v23, %v458_v19  ;;  %v470_v28 = vsel %vm467_vm2, %v466_v13, %v2232_v16  ;;  %v448_v18 = vld [vmem:[%s3414_s1 + $0x10] sm:$0xff]  ;;  %v706_v19 = vshrl.u32 %v455_v7, 7 }
  0xd5   : > { %v2238_v29 = vunpack.i.h.bf16 %v2236_v24  ;;  %v2237_v30 = vunpack.i.l.bf16 %v2236_v24  ;;  %v2026_v31 = vpack.c.bf16 %v470_v28, %v460_v27  ;;  %v489_v32 = vsel %vm487_vm3, %v2242_v21, %v2243_v20 }
  0xd6   : > { %2025 = vmatprep.subr.bf16.mxu0 %v2024_v25  ;;  %2042 = vmatpush3.bf16.msra.mxu1 %v2041_v26  ;;  %v486_v33 = vpop.permute.xlu1 %485  ;;  %v711_v22 = vsub.s32 1, %v706_v19  ;;  %v715_v23 = vsub.s32 2, %v706_v19 }
  0xd7   : > { %2027 = vmatpush1.bf16.msra.mxu0 %v2026_v31  ;;  %v488_v34 = vsel %vm487_vm3, %v2243_v20, %v486_v33  ;;  %v490_v35 = vsel %vm487_vm3, %v486_v33, %v2242_v21  ;;  %v479_v36 = vsel %vm477_vm4, %v2237_v30, %v2238_v29  ;;  %2043 = vmatprep.subr.bf16.mxu1 %v2559_v0  ;;  %v707_v20 = vsub.s32 0, %v706_v19  ;;  %v441_v21 = vld [vmem:[%s3424_s11] sm:$0x7]  ;;  %v443_v19 = vld [vmem:[%s3416_s3 + $0x8] sm:$0xff] }
  0xd8   : > { %v476_v37 = vpop.permute.xlu0 %475  ;;  %v2028_v38 = vpack.c.bf16 %v489_v32, %v479_v36  ;;  %v2907_v25 = vrot.slane %v441_v21, %v711_v22  ;;  %v2909_v26 = vrot.slane %v441_v21, %v715_v23 }
  0xd9   : > { %v478_v39 = vsel %vm477_vm4, %v2238_v29, %v476_v37  ;;  %v480_v40 = vsel %vm477_vm4, %v476_v37, %v2237_v30  ;;  %v2905_v24 = vrot.slane %v441_v21, %v707_v20  ;;  %v444_v20 = vld [vmem:[%s3416_s3 + $0x10] sm:$0xff]  ;;  %v733_v21 = vld [vmem:[%s3419_s6 + $0x8] sm:$0xff] }
  0xda   : > { %v2030_v41 = vpack.c.bf16 %v490_v35, %v480_v40  ;;  %v2044_v42 = vpack.c.bf16 %v488_v34, %v478_v39  ;;  %2029 = vmatprep.subr.bf16.mxu0 %v2028_v38  ;;  %v492_v43 = vpop.permute.xlu1 %491 }
  0xdc   : > { %v2246_v44 = vpop.permute.xlu0 %2245  ;;  %2031 = vmatpush1.bf16.msra.mxu0 %v2030_v41  ;;  %2045 = vmatpush3.bf16.msra.mxu1 %v2044_v42 }
  0xdd   : > { %v2248_v45 = vunpack.i.h.bf16 %v2246_v44  ;;  %v2247_v46 = vunpack.i.l.bf16 %v2246_v44  ;;  %2046 = vmatprep.subr.bf16.mxu1 %v2559_v0 }
  0xde   : > { %v2256_v47 = vpop.permute.xlu1 %2255 }
  0xdf   : > { %v2258_v48 = vunpack.i.h.bf16 %v2256_v47  ;;  %v2257_v49 = vunpack.i.l.bf16 %v2256_v47  ;;  %v498_v50 = vsel %vm497_vm5, %v2247_v46, %v2248_v45  ;;  %v500_v51 = vsel %vm497_vm5, %v2248_v45, %v492_v43 }
  0xe0   : > { %v2251_v52 = vpop.permute.xlu0 %2250  ;;  %v2032_v53 = vpack.c.bf16 %v498_v50, %v2772_v3  ;;  %v2047_v54 = vpack.c.bf16 %v500_v51, %v2766_v1  ;;  %v499_v55 = vsel %vm497_vm5, %v492_v43, %v2247_v46 }
  0xe1   : > { %v2253_v56 = vunpack.i.h.bf16 %v2251_v52  ;;  %v2252_v57 = vunpack.i.l.bf16 %v2251_v52  ;;  %v2034_v58 = vpack.c.bf16 %v499_v55, %v2769_v2  ;;  %v518_v59 = vsel %vm517_vm6, %v2257_v49, %v2258_v48 }
  0xe2   : > { %2033 = vmatprep.subr.bf16.mxu0 %v2032_v53  ;;  %2048 = vmatpush3.bf16.msra.mxu1 %v2047_v54  ;;  %v512_v60 = vpop.permute.xlu1 %511 }
  0xe3   : > { %2035 = vmatpush1.bf16.msra.mxu0 %v2034_v58  ;;  %v519_v61 = vsel %vm517_vm6, %v512_v60, %v2257_v49  ;;  %v520_v62 = vsel %vm517_vm6, %v2258_v48, %v512_v60  ;;  %v508_v63 = vsel %vm507_vm7, %v2252_v57, %v2253_v56  ;;  %2049 = vmatprep.subr.bf16.mxu1 %v2559_v0 }
  0xe4   : > { %v502_v1 = vpop.permute.xlu0 %501  ;;  %v2036_v2 = vpack.c.bf16 %v518_v59, %v508_v63 }
  0xe5   : > { %v509_v3 = vsel %vm507_vm7, %v502_v1, %v2252_v57  ;;  %v510_v4 = vsel %vm507_vm7, %v2253_v56, %v502_v1 }
  0xe6   : > { %v2038_v5 = vpack.c.bf16 %v519_v61, %v509_v3  ;;  %v2050_v8 = vpack.c.bf16 %v520_v62, %v510_v4  ;;  %2037 = vmatprep.subr.bf16.mxu0 %v2036_v2  ;;  %v526_v10 = vpop.permute.xlu1 %525 }
  0xe8   : > { %v524_v11 = vpop.permute.xlu0 %523  ;;  %2039 = vmatpush1.bf16.msra.mxu0 %v2038_v5  ;;  %2051 = vmatpush3.bf16.msra.mxu1 %v2050_v8  ;;  %v732_v5 = vld [vmem:[%s3419_s6] sm:$0xff]  ;;  %v2570_v8 = vmov 0  }
  0xe9   : > { %v528_v12 = vsel %vm527_vm8, %v524_v11, %v526_v10  ;;  %1963 = vmatprep.subr.mxu1 %v2566_v6  ;;  %2260 = vset.pattern.permute.xlu1 %v2570_v8 }
  0xea   : > { %557 = vmatprep.subr.mxu0 %v528_v12  ;;  %2259 = vset.pattern.permute.xlu0 %v2570_v8 }
  0xec   : > { %v522_v13 = vpop.permute.xlu0 %521 }
  0xed   : > { %v529_v15 = vsel %vm527_vm8, %v522_v13, %v524_v11  ;;  %v530_v16 = vsel %vm527_vm8, %v526_v10, %v522_v13 }
  0xee   : > { %558 = vmatpush1.msra.mxu0 %v529_v15  ;;  %1964 = vmatpush3.msra.mxu1 %v530_v16  ;;  %v442_v16 = vld [vmem:[%s3416_s3] sm:$0xff] }
  0xef   : > { %1894 = vmatmul.mubr.msk.f32.vlgmr.msra.gmra.mrb[0].mxu0 %vm531_vm9, %v446_v14  ;;  %1966 = vmatmul.mubr.msk.f32.vlgmr.msra.gmra.mrb[0].mxu1 %vm531_vm9, %v446_v14 }
  0xf0   : > { %611 = vmatprep.mubr.f32.mxu0 %v2566_v6  ;;  %1968 = vmatprep.mubr.msk.f32.mxu1 %vm2568_vm0, %v2566_v6 }
  0xf1   : > { %2052 = vmatprep.subr.bf16.mxu0 %v2559_v0  ;;  %2055 = vmatprep.subr.bf16.mxu1 %v2559_v0 }
  0xf3   : > { %1895 = vmatmul.mubr.msk.f32.gmra.mrb[2].mxu0 %vm531_vm9, %v447_v17  ;;  %1969 = vmatmul.mubr.msk.f32.gmra.mrb[2].mxu1 %vm531_vm9, %v447_v17 }
  0xf4   : > { %617 = vmatprep.mubr.f32.mxu0 %v2566_v6  ;;  %1971 = vmatprep.mubr.msk.f32.mxu1 %vm2568_vm0, %v2566_v6 }
  0xf7   : > { %1896 = vmatmul.mubr.msk.f32.gmra.mrb[4].mxu0 %vm531_vm9, %v448_v18  ;;  %1972 = vmatmul.mubr.msk.f32.gmra.mrb[4].mxu1 %vm531_vm9, %v448_v18 }
  0xf8   : > { %1980 = vmatprep.mubr.msk.f32.mxu0 %vm2568_vm0, %v2566_v6  ;;  %1995 = vmatprep.mubr.msk.f32.mxu1 %vm2568_vm0, %v2566_v6 }
 0x1c2   : > { %v607_v27 = vpop.f32.mrb[0].mxu0  ;;  %v690_v28 = vpop.f32.mrb[0].mxu1 }
 0x1c3   : > { %v2912_v29 = vmul.f32 %v2905_v24, %v607_v27  ;;  %v609_v30 = vpop.f32.mrb[1].mxu0  ;;  %v1967_v7 = vpop.f32.mrb[1].mxu1  ;;  %v2918_v32 = vmul.f32 %v2909_v26, %v690_v28 }
 0x1c4   : > { %v2915_v31 = vmul.f32 %v2907_v25, %v609_v30 }
 0x1c5   : > { %v747_v40 = vmul.f32 %v2912_v29, %v2912_v29  ;;  %v749_v53 = vmul.f32 %v2918_v32, %v2918_v32 }
 0x1c6   : > { %v613_v33 = vpop.f32.mrb[2].mxu0  ;;  %v695_v34 = vpop.f32.mrb[2].mxu1  ;;  %v735_v35 = vadd.f32 %v2915_v31, %v2912_v29  ;;  %v748_v41 = vmul.f32 %v2915_v31, %v2915_v31 }
 0x1c7   : > { %v2923_v36 = vmul.f32 %v2905_v24, %v613_v33  ;;  %v615_v37 = vpop.f32.mrb[3].mxu0  ;;  %v2926_v38 = vmul.f32 %v2909_v26, %v695_v34  ;;  %v1970_v39 = vpop.f32.mrb[3].mxu1 }
 0x1c8   : > { %v2933_v42 = vmul.f32 %v2907_v25, %v615_v37  ;;  %v736_v43 = vadd.f32 %v735_v35, %v2918_v32  ;;  %v756_v58 = vadd.f32 %v748_v41, %v747_v40 }
 0x1c9   : > { %v750_v44 = vmul.f32 %v2923_v36, %v2923_v36  ;;  %v752_v48 = vmul.f32 %v2926_v38, %v2926_v38 }
 0x1ca   : > { %v751_v45 = vmul.f32 %v2933_v42, %v2933_v42  ;;  %737 = vadd.xlane.f32.xlu1 %v736_v43  ;;  %v739_v46 = vadd.f32 %v2933_v42, %v2923_v36  ;;  %v619_v47 = vpop.f32.mrb[4].mxu0  ;;  %v700_v49 = vpop.f32.mrb[4].mxu1  ;;  %v757_v1 = vadd.f32 %v756_v58, %v749_v53  ;;  %v729_v53 = vld [vmem:[%s3418_s5] sm:$0xff] }
 0x1cb   : > { %v2945_v50 = vmul.f32 %v2905_v24, %v619_v47  ;;  %v621_v51 = vpop.f32.mrb[5].mxu0  ;;  %v2948_v52 = vmul.f32 %v2909_v26, %v700_v49  ;;  %v1973_v54 = vpop.f32.mrb[5].mxu1 }
 0x1cc   : > { %v740_v55 = vadd.f32 %v739_v46, %v2926_v38  ;;  %v2954_v56 = vmul.f32 %v2907_v25, %v621_v51  ;;  %v760_v57 = vadd.f32 %v751_v45, %v750_v44 }
 0x1cd   : > { %v753_v59 = vmul.f32 %v2945_v50, %v2945_v50  ;;  %v755_v63 = vmul.f32 %v2948_v52, %v2948_v52 }
 0x1ce   : > { %741 = vadd.xlane.f32.xlu0 %v740_v55  ;;  %v754_v60 = vmul.f32 %v2954_v56, %v2954_v56  ;;  %v761_v61 = vadd.f32 %v760_v57, %v752_v48  ;;  %v743_v62 = vadd.f32 %v2954_v56, %v2945_v50  ;;  %v730_v57 = vld [vmem:[%s3418_s5 + $0x8] sm:$0xff] }
 0x1d0   : > { %762 = vadd.xlane.f32.xlu1 %v761_v61  ;;  %v764_v2 = vadd.f32 %v754_v60, %v753_v59  ;;  %v744_v3 = vadd.f32 %v743_v62, %v2948_v52  ;;  %v731_v60 = vld [vmem:[%s3418_s5 + $0x10] sm:$0xff] }
 0x1d2   : > { %758 = vadd.xlane.f32.xlu0 %v757_v1  ;;  %v765_v4 = vadd.f32 %v764_v2, %v755_v63  ;;  %v734_v63 = vld [vmem:[%s3419_s6 + $0x10] sm:$0xff] }
 0x1d4   : > { %766 = vadd.xlane.f32.xlu1 %v765_v4 }
 0x1d6   : > { %745 = vadd.xlane.f32.xlu0 %v744_v3 }
 0x1e5   : > { %1003 = vperm.xlu1 %2260, %v732_v5  }
 0x1e9   : > { %1008 = vperm.xlu1 %2260, %v733_v21  }
 0x257   : > { %v738_v10 = vpop.xlane.xlu1 %737 }
 0x25b   : > { %v742_v11 = vpop.xlane.xlu0 %741 }
 0x25c   : > { %v2053_v12 = vpack.c.bf16 %v742_v11, %v738_v10 }
 0x25d   : > { %v763_v13 = vpop.xlane.xlu1 %762 }
 0x25e   : > { %2054 = vmatpush3.bf16.msra.mxu0 %v2053_v12 }
 0x25f   : > { %v759_v14 = vpop.xlane.xlu0 %758  ;;  %1978 = vmatprep.subr.mxu0 %v2566_v6 }
 0x260   : > { %v2056_v15 = vpack.c.bf16 %v763_v13, %v759_v14 }
 0x261   : > { %v767_v18 = vpop.xlane.xlu1 %766 }
 0x262   : > { %2057 = vmatpush3.bf16.msra.mxu1 %v2056_v15 }
 0x263   : > { %v746_v17 = vpop.xlane.xlu0 %745  ;;  %1993 = vmatprep.subr.mxu1 %v2566_v6 }
 0x264   : > { %1979 = vmatpush3.msra.mxu0 %v746_v17 }
 0x265   : > { %1981 = vmatmul.mubr.msk.f32.vlgmr.msra.gmra.mrb[6].mxu0 %vm768_vm10, %v442_v16  ;;  %v1004_v1 = vpop.permute.xlu1 %1003 }
 0x266   : > { %1994 = vmatpush3.msra.mxu1 %v767_v18  ;;  %1983 = vmatprep.mubr.msk.f32.mxu0 %vm2568_vm0, %v2566_v6 }
 0x267   : > { %1996 = vmatmul.mubr.msk.f32.vlgmr.msra.gmra.mrb[6].mxu1 %vm768_vm10, %v442_v16  ;;  %2110 = vmatprep.subr.bf16.mxu1 %v2559_v0 }
 0x268   : > { %1998 = vmatprep.mubr.msk.f32.mxu1 %vm2568_vm0, %v2566_v6 }
 0x269   : > { %1984 = vmatmul.mubr.msk.f32.gmra.mrb[8].mxu0 %vm768_vm10, %v443_v19  ;;  %v1009_v2 = vpop.permute.xlu1 %1008 }
 0x26a   : > { %1986 = vmatprep.mubr.msk.f32.mxu0 %vm2568_vm0, %v2566_v6 }
 0x26b   : > { %1999 = vmatmul.mubr.msk.f32.gmra.mrb[8].mxu1 %vm768_vm10, %v443_v19 }
 0x26c   : > { %2001 = vmatprep.mubr.msk.f32.mxu1 %vm2568_vm0, %v2566_v6 }
 0x26d   : > { %1987 = vmatmul.mubr.msk.f32.gmra.mrb[10].mxu0 %vm768_vm10, %v444_v20 }
 0x26f   : > { %2002 = vmatmul.mubr.msk.f32.gmra.mrb[10].mxu1 %vm768_vm10, %v444_v20 }
 0x338   : > { %v844_v22 = vpop.f32.mrb[6].mxu0 }
 0x339   : > { %v938_v23 = vmul.f32 %v844_v22, %v844_v22  ;;  %952 = vperm.xlu0 %2259, %v844_v22   ;;  %v1982_v27 = vpop.f32.mrb[7].mxu0 }
 0x33a   : > { %v924_v28 = vpop.f32.mrb[6].mxu1 }
 0x33b   : > { %v941_v30 = vsub.f32 %v924_v28, %v938_v23  ;;  %v1997_v7 = vpop.f32.mrb[7].mxu1 }
 0x33c   : > { %v849_v33 = vpop.f32.mrb[8].mxu0 }
 0x33d   : > { %v944_v34 = vadd.f32 1e-05, %v941_v30  ;;  %v939_v35 = vmul.f32 %v849_v33, %v849_v33  ;;  %957 = vperm.xlu1 %2260, %v849_v33   ;;  %v1985_v37 = vpop.f32.mrb[9].mxu0 }
 0x33e   : > { %v929_v39 = vpop.f32.mrb[8].mxu1 }
 0x33f   : > { %2416 = vrsqrt.f32 %v944_v34  ;;  %v942_v40 = vsub.f32 %v929_v39, %v939_v35  ;;  %v2000_v41 = vpop.f32.mrb[9].mxu1 }
 0x340   : > { %v854_v43 = vpop.f32.mrb[10].mxu0 }
 0x341   : > { %v945_v44 = vadd.f32 1e-05, %v942_v40  ;;  %v940_v45 = vmul.f32 %v854_v43, %v854_v43  ;;  %962 = vperm.xlu1 %2260, %v854_v43   ;;  %v1988_v46 = vpop.f32.mrb[11].mxu0 }
 0x342   : > { %v934_v47 = vpop.f32.mrb[10].mxu1 }
 0x343   : > { %2418 = vrsqrt.f32 %v945_v44  ;;  %v943_v48 = vsub.f32 %v934_v47, %v940_v45  ;;  %v2003_v49 = vpop.f32.mrb[11].mxu1 }
 0x345   : > { %v946_v51 = vadd.f32 1e-05, %v943_v48 }
 0x347   : > { %2420 = vrsqrt.f32 %v946_v51 }
 0x349   : > { %v2417_v54 = vpop.eup %2416 }
 0x34a   : > { %v974_v55 = vmul.f32 %v2417_v54, %v729_v53 }
 0x34c   : > { %979 = vperm.xlu1 %2260, %v974_v55  }
 0x34d   : > { %v2419_v58 = vpop.eup %2418 }
 0x34e   : > { %v975_v59 = vmul.f32 %v2419_v58, %v730_v57 }
 0x350   : > { %984 = vperm.xlu1 %2260, %v975_v59  }
 0x351   : > { %v2421_v61 = vpop.eup %2420 }
 0x352   : > { %v976_v62 = vmul.f32 %v2421_v61, %v731_v60 }
 0x354   : > { %989 = vperm.xlu1 %2260, %v976_v62  }
 0x358   : > { %1013 = vperm.xlu1 %2260, %v734_v63  }
 0x3b8   : > { %v953_v4 = vpop.permute.xlu0 %952 }
 0x3b9   : > { %v965_v8 = vsub.f32 %v2912_v29, %v953_v4  ;;  %v966_v10 = vsub.f32 %v2915_v31, %v953_v4  ;;  %v967_v20 = vsub.f32 %v2918_v32, %v953_v4 }
 0x3bc   : > { %v958_v3 = vpop.permute.xlu1 %957 }
 0x3bd   : > { %v968_v14 = vsub.f32 %v2923_v36, %v958_v3  ;;  %v969_v17 = vsub.f32 %v2933_v42, %v958_v3  ;;  %v970_v18 = vsub.f32 %v2926_v38, %v958_v3 }
 0x3c0   : > { %v963_v5 = vpop.permute.xlu1 %962 }
 0x3c1   : > { %v971_v38 = vsub.f32 %v2945_v50, %v963_v5  ;;  %v972_v33 = vsub.f32 %v2954_v56, %v963_v5  ;;  %v973_v45 = vsub.f32 %v2948_v52, %v963_v5 }
 0x3cb   : > { %v980_v11 = vpop.permute.xlu1 %979 }
 0x3cc   : > { %v992_v12 = vmul.f32 %v980_v11, %v965_v8  ;;  %v993_v13 = vmul.f32 %v980_v11, %v966_v10  ;;  %v994_v31 = vmul.f32 %v980_v11, %v967_v20 }
 0x3ce   : > { %v1016_v15 = vadd.f32 %v1004_v1, %v992_v12  ;;  %v1017_v16 = vadd.f32 %v1004_v1, %v993_v13  ;;  %v1018_v39 = vadd.f32 %v1004_v1, %v994_v31 }
 0x3cf   : > { %v985_v19 = vpop.permute.xlu1 %984 }
 0x3d0   : > { %v1025_v21 = vmax.f32 %v1016_v15, 0.0  ;;  %v1026_v22 = vmax.f32 %v1017_v16, 0.0  ;;  %v995_v23 = vmul.f32 %v985_v19, %v968_v14  ;;  %v996_v29 = vmul.f32 %v985_v19, %v969_v17  ;;  %v1044_v15 = vld [vmem:[#allocation2 + $0x8] sm:$0xff] }
 0x3d1   : > { %v997_v27 = vmul.f32 %v985_v19, %v970_v18  ;;  %v1027_v49 = vmax.f32 %v1018_v39, 0.0  ;;  %1906 = vmatprep.mubr.msk.f32.mxu0 %vm1261_vm11, %v1044_v15  ;;  %1907 = vmatprep.mubr.msk.f32.mxu1 %vm1261_vm11, %v1044_v15 }
 0x3d2   : > { %v3016_v28 = vmul.f32 %v1025_v21, %v2905_v24  ;;  %v3019_v36 = vmul.f32 %v1026_v22, %v2907_v25  ;;  %v1019_v30 = vadd.f32 %v1009_v2, %v995_v23  ;;  %v1020_v7 = vadd.f32 %v1009_v2, %v996_v29 }
 0x3d3   : > { %v990_v42 = vpop.permute.xlu1 %989  ;;  %v1021_v32 = vadd.f32 %v1009_v2, %v997_v27  ;;  %v3049_v60 = vmul.f32 %v1027_v49, %v2909_v26 }
 0x3d4   : > { %v1028_v34 = vmax.f32 %v1019_v30, 0.0  ;;  %v1029_v35 = vmax.f32 %v1020_v7, 0.0  ;;  %v2261_v37 = vpack.i.bf16 %v3019_v36, %v3016_v28  ;;  %v998_v40 = vmul.f32 %v990_v42, %v971_v38 }
 0x3d5   : > { %v999_v41 = vmul.f32 %v990_v42, %v972_v33  ;;  %v1030_v50 = vmax.f32 %v1021_v32, 0.0  ;;  %v1000_v51 = vmul.f32 %v990_v42, %v973_v45  ;;  %v2326_v12 = vpack.i.bf16 %v3049_v60, %v3019_v36 }
 0x3d6   : > { %v3026_v43 = vmul.f32 %v1029_v35, %v2907_v25  ;;  %2262 = vrot.lane.b32.xlu0 %v2261_v37, %s2561_s29  ;;  %v3031_v47 = vmul.f32 %v1028_v34, %v2905_v24 }
 0x3d7   : > { %v1014_v44 = vpop.permute.xlu1 %1013  ;;  %v3038_v55 = vmul.f32 %v1030_v50, %v2909_v26 }
 0x3d8   : > { %v1022_v46 = vadd.f32 %v1014_v44, %v998_v40  ;;  %v1023_v56 = vadd.f32 %v1014_v44, %v999_v41  ;;  %v2276_v48 = vpack.i.bf16 %v3026_v43, %v3019_v36  ;;  %v1024_v52 = vadd.f32 %v1014_v44, %v1000_v51 }
 0x3d9   : > { %v2271_v59 = vpack.i.bf16 %v3031_v47, %v3016_v28  ;;  %v2281_v62 = vpack.i.bf16 %v3038_v55, %v3049_v60  ;;  %v2082_v1 = vpack.c.bf16 %v3026_v43, %v3019_v36  ;;  %v2084_v2 = vpack.c.bf16 %v3031_v47, %v3016_v28 }
 0x3da   : > { %v1031_v53 = vmax.f32 %v1022_v46, 0.0  ;;  %v1032_v54 = vmax.f32 %v1023_v56, 0.0  ;;  %2267 = vrot.lane.b32.xlu0 %v2261_v37, %s2562_s16  ;;  %2277 = vrot.lane.b32.xlu1 %v2276_v48, %s2560_s28  ;;  %v1033_v61 = vmax.f32 %v1024_v52, 0.0  ;;  %v2129_v3 = vpack.c.bf16 %v3038_v55, %v3049_v60 }
 0x3db   : > { %v2286_v5 = vpack.i.bf16 %v3031_v47, %v3049_v60  ;;  %v2331_v10 = vpack.i.bf16 %v3026_v43, %v3016_v28 }
 0x3dc   : > { %v3041_v57 = vmul.f32 %v1031_v53, %v2905_v24  ;;  %v3044_v58 = vmul.f32 %v1032_v54, %v2907_v25  ;;  %v3066_v4 = vmul.f32 %v1033_v61, %v2909_v26 }
 0x3de   : > { %2272 = vrot.lane.b32.xlu0 %v2271_v59, %s2560_s28  ;;  %2297 = vrot.lane.b32.xlu1 %v2276_v48, %s2563_s18  ;;  %v2311_v63 = vpack.i.bf16 %v3044_v58, %v3041_v57  ;;  %v2316_v8 = vpack.i.bf16 %v3026_v43, %v3041_v57  ;;  %v2321_v11 = vpack.i.bf16 %v3038_v55, %v3044_v58 }
 0x3df   : > { %v2386_v13 = vpack.i.bf16 %v3066_v4, %v3044_v58  ;;  %v2371_v14 = vpack.i.bf16 %v3031_v47, %v3066_v4 }
 0x3e2   : > { %2282 = vrot.lane.b32.xlu0 %v2281_v62, %s2560_s28  ;;  %2312 = vrot.lane.b32.xlu1 %v2311_v63, %s2560_s28 }
 0x3e6   : > { %2287 = vrot.lane.b32.xlu0 %v2286_v5, %s2561_s29  ;;  %1061 = vrot.lane.b32.xlu1 %v3066_v4, %s2560_s28  ;;  %s3453_s28 = smov 110  }
 0x3ea   : > { %2292 = vrot.lane.b32.xlu0 %v2271_v59, %s2563_s18  ;;  %2317 = vrot.lane.b32.xlu1 %v2316_v8, %s2561_s29 }
 0x3ee   : > { %2302 = vrot.lane.b32.xlu0 %v2281_v62, %s2563_s18  ;;  %2332 = vrot.lane.b32.xlu1 %v2331_v10, %s2564_s27 }
 0x3f2   : > { %2307 = vrot.lane.b32.xlu0 %v2286_v5, %s2562_s16  ;;  %2337 = vrot.lane.b32.xlu1 %v2276_v48, %s3452_s17 }
 0x3f6   : > { %2322 = vrot.lane.b32.xlu0 %v2321_v11, %s2561_s29  ;;  %1088 = vrot.lane.b32.xlu1 %v3066_v4, %s2561_s29  ;;  %s3454_s29 = smov 109  }
 0x3fa   : > { %2327 = vrot.lane.b32.xlu0 %v2326_v12, %s2564_s27  ;;  %2347 = vrot.lane.b32.xlu1 %v2311_v63, %s2563_s18 }
 0x3fe   : > { %2342 = vrot.lane.b32.xlu0 %v2281_v62, %s3452_s17  ;;  %1115 = vrot.lane.b32.xlu1 %v3066_v4, %s2563_s18 }
 0x402   : > { %2357 = vrot.lane.b32.xlu0 %v2321_v11, %s2562_s16  ;;  %2352 = vrot.lane.b32.xlu1 %v2316_v8, %s2562_s16 }
 0x406   : > { %2367 = vrot.lane.b32.xlu0 %v2321_v11, %s2564_s27  ;;  %1142 = vrot.lane.b32.xlu1 %v3066_v4, %s2562_s16 }
 0x40a   : > { %1157 = vrot.lane.b32.xlu0 %v3041_v57, %s2564_s27  ;;  %2362 = vrot.lane.b32.xlu1 %v2271_v59, %s3452_s17 }
 0x40e   : > { %2387 = vrot.lane.b32.xlu0 %v2386_v13, %s3452_s17  ;;  %2372 = vrot.lane.b32.xlu1 %v2371_v14, %s2564_s27 }
 0x412   : > { %1184 = vrot.lane.b32.xlu0 %v3041_v57, %s3452_s17  ;;  %2377 = vrot.lane.b32.xlu1 %v2326_v12, %s3453_s28  ;;  %s2151_s17 = smul.u32 384, %s2658_s25  ;;  %s1790_s25 = scalar_lea.sflag [#allocation4], %s430_s19 }
 0x414   : > { %s3371_s27 = scalar_lea.hbm %s3425_s12, %s2151_s17 }
 0x416   : > { %2392 = vrot.lane.b32.xlu0 %v2321_v11, %s3453_s28  ;;  %2382 = vrot.lane.b32.xlu1 %v2331_v10, %s3453_s28 }
 0x41a   : > { %1211 = vrot.lane.b32.xlu0 %v3041_v57, %s3453_s28  ;;  %2397 = vrot.lane.b32.xlu1 %v2371_v14, %s3453_s28  ;;  %s432_s28 = scalar_lea.vmem [#allocation7], %s2149_s15 }
 0x41e   : > { %2407 = vrot.lane.b32.xlu0 %v2281_v62, %s3454_s29  ;;  %2402 = vrot.lane.b32.xlu1 %v2276_v48, %s3454_s29 }
 0x422   : > { %1244 = vrot.lane.b32.xlu0 %v3044_v58, %s3454_s29  ;;  %2412 = vrot.lane.b32.xlu1 %v2271_v59, %s3454_s29 }
 0x426   : > { %1238 = vrot.lane.b32.xlu0 %v3041_v57, %s3454_s29  ;;  %1250 = vrot.lane.b32.xlu1 %v3066_v4, %s3454_s29  ;;  %s1804_s29 = sshll.u32 %s432_s28, 4  ;;  %s3373_s29 = int_to_ptr.vmem [resolvable:$true] %s1804_s29 }
 0x427   : > { %s2485_s14 = scalar_lea.vmem %s3373_s29, 384 }
 0x428   : > { %p2486_p12 = scmp.ne.s32.totalorder %s3373_s29, %s2485_s14 }
 0x42a   : > { %p2487_p2 = pnand %p2486_p12, %p3455_p1 }
 0x42c   : > { %p2488_p3 = pneg %p2487_p2 }
 0x448   : > { %v2263_v16 = vpop.permute.xlu0 %2262 }
 0x449   : > { %v2265_v30 = vunpack.i.h.bf16 %v2263_v16  ;;  %v2264_v7 = vunpack.i.l.bf16 %v2263_v16 }
 0x44b   : > { %v1093_v51 = vsel %vm467_vm2, %v2264_v7, %v2265_v30 }
 0x44c   : > { %v3126_v17 = vpop.permute.xlu0 %2267  ;;  %v2278_v18 = vpop.permute.xlu1 %2277 }
 0x44d   : > { %v2280_v21 = vunpack.i.h.bf16 %v2278_v18  ;;  %v2279_v22 = vunpack.i.l.bf16 %v2278_v18  ;;  %v2270_v18 = vunpack.i.h.bf16 %v3126_v17 }
 0x450   : > { %v2273_v19 = vpop.permute.xlu0 %2272  ;;  %v3128_v20 = vpop.permute.xlu1 %2297 }
 0x451   : > { %v2275_v23 = vunpack.i.h.bf16 %v2273_v19  ;;  %v2274_v29 = vunpack.i.l.bf16 %v2273_v19  ;;  %v2300_v19 = vunpack.i.h.bf16 %v3128_v20 }
 0x453   : > { %v1066_v27 = vsel %vm457_vm1, %v2274_v29, %v2279_v22  ;;  %v1067_v31 = vsel %vm457_vm1, %v2275_v23, %v2280_v21 }
 0x454   : > { %v2283_v42 = vpop.permute.xlu0 %2282  ;;  %v2313_v38 = vpop.permute.xlu1 %2312  ;;  %v2058_v33 = vpack.c.bf16 %v1067_v31, %v1066_v27 }
 0x455   : > { %v2285_v32 = vunpack.i.h.bf16 %v2283_v42  ;;  %v2284_v34 = vunpack.i.l.bf16 %v2283_v42  ;;  %v2315_v35 = vunpack.i.h.bf16 %v2313_v38  ;;  %v2314_v37 = vunpack.i.l.bf16 %v2313_v38 }
 0x456   : > { %2059 = vmatprep.subr.bf16.mxu0 %v2058_v33 }
 0x457   : > { %v1063_v39 = vsel %vm457_vm1, %v2279_v22, %v2284_v34  ;;  %v1064_v40 = vsel %vm457_vm1, %v2280_v21, %v2285_v32  ;;  %v1069_v41 = vsel %vm457_vm1, %v2284_v34, %v2274_v29  ;;  %v1070_v44 = vsel %vm457_vm1, %v2285_v32, %v2275_v23 }
 0x458   : > { %v2060_v45 = vpack.c.bf16 %v1070_v44, %v1069_v41  ;;  %v2111_v50 = vpack.c.bf16 %v1064_v40, %v1063_v39  ;;  %v2288_v46 = vpop.permute.xlu0 %2287  ;;  %v1062_v56 = vpop.permute.xlu1 %1061  ;;  %v1068_v48 = vsel %vm457_vm1, %v2314_v37, %v2315_v35  ;;  %v2299_v21 = vunpack.i.l.bf16 %v3128_v20 }
 0x459   : > { %v2289_v49 = vunpack.i.l.bf16 %v2288_v46  ;;  %v2062_v53 = vpack.c.bf16 %v1093_v51, %v1068_v48  ;;  %v1065_v59 = vsel %vm457_vm1, %v2315_v35, %v1062_v56  ;;  %v1071_v61 = vsel %vm457_vm1, %v1062_v56, %v2314_v37 }
 0x45a   : > { %2061 = vmatpush1.bf16.msra.mxu0 %v2060_v45  ;;  %2112 = vmatpush1.bf16.msra.mxu1 %v2111_v50  ;;  %v2290_v22 = vunpack.i.h.bf16 %v2288_v46  ;;  %v2269_v40 = vunpack.i.l.bf16 %v3126_v17 }
 0x45b   : > { %v1090_v54 = vsel %vm467_vm2, %v2265_v30, %v2289_v49  ;;  %v1096_v52 = vsel %vm467_vm2, %v2289_v49, %v2264_v7  ;;  %2113 = vmatprep.subr.bf16.mxu1 %v2559_v0  ;;  %2063 = vmatprep.subr.bf16.mxu0 %v2062_v53 }
 0x45c   : > { %v2064_v62 = vpack.c.bf16 %v1096_v52, %v1071_v61  ;;  %v2114_v63 = vpack.c.bf16 %v1090_v54, %v1065_v59  ;;  %v2293_v5 = vpop.permute.xlu0 %2292  ;;  %v2318_v8 = vpop.permute.xlu1 %2317 }
 0x45d   : > { %v2295_v14 = vunpack.i.h.bf16 %v2293_v5  ;;  %v2294_v15 = vunpack.i.l.bf16 %v2293_v5  ;;  %v2320_v16 = vunpack.i.h.bf16 %v2318_v8  ;;  %v2319_v23 = vunpack.i.l.bf16 %v2318_v8 }
 0x45e   : > { %2065 = vmatpush1.bf16.msra.mxu0 %v2064_v62  ;;  %2115 = vmatpush1.bf16.msra.mxu1 %v2114_v63 }
 0x45f   : > { %2116 = vmatprep.subr.bf16.mxu1 %v2559_v0  ;;  %v1094_v33 = vsel %vm467_vm2, %v2290_v22, %v2320_v16  ;;  %v1120_v32 = vsel %vm477_vm4, %v2294_v15, %v2299_v21  ;;  %v1121_v20 = vsel %vm477_vm4, %v2295_v14, %v2300_v19 }
 0x460   : > { %v2303_v10 = vpop.permute.xlu0 %2302  ;;  %v3156_v11 = vpop.permute.xlu1 %2332  ;;  %v2070_v54 = vpack.c.bf16 %v1121_v20, %v1120_v32 }
 0x461   : > { %v2305_v31 = vunpack.i.h.bf16 %v2303_v10  ;;  %v2304_v30 = vunpack.i.l.bf16 %v2303_v10 }
 0x463   : > { %v1117_v56 = vsel %vm477_vm4, %v2299_v21, %v2304_v30  ;;  %v1118_v48 = vsel %vm477_vm4, %v2300_v19, %v2305_v31  ;;  %v1123_v53 = vsel %vm477_vm4, %v2304_v30, %v2294_v15  ;;  %v1124_v17 = vsel %vm477_vm4, %v2305_v31, %v2295_v14 }
 0x464   : > { %v3158_v12 = vpop.permute.xlu0 %2307  ;;  %v3160_v13 = vpop.permute.xlu1 %2337  ;;  %v2120_v61 = vpack.c.bf16 %v1118_v48, %v1117_v56  ;;  %v2072_v5 = vpack.c.bf16 %v1124_v17, %v1123_v53  ;;  %v1147_v14 = vsel %vm487_vm3, %v2269_v40, %v2270_v18  ;;  %v2334_v56 = vunpack.i.l.bf16 %v3156_v11 }
 0x465   : > { %v2309_v52 = vunpack.i.l.bf16 %v3158_v12  ;;  %v2310_v21 = vunpack.i.h.bf16 %v3158_v12  ;;  %v2339_v36 = vunpack.i.l.bf16 %v3160_v13 }
 0x467   : > { %v1150_v19 = vsel %vm487_vm3, %v2309_v52, %v2269_v40 }
 0x468   : > { %v2323_v29 = vpop.permute.xlu0 %2322  ;;  %v1089_v27 = vpop.permute.xlu1 %1088 }
 0x469   : > { %v2325_v7 = vunpack.i.h.bf16 %v2323_v29  ;;  %v2324_v42 = vunpack.i.l.bf16 %v2323_v29  ;;  %v1098_v38 = vsel %vm467_vm2, %v1089_v27, %v2319_v23 }
 0x46b   : > { %v1097_v34 = vsel %vm467_vm2, %v2325_v7, %v2290_v22  ;;  %v1091_v35 = vsel %vm467_vm2, %v2320_v16, %v2325_v7  ;;  %v1092_v37 = vsel %vm467_vm2, %v2324_v42, %v1089_v27  ;;  %v1095_v39 = vsel %vm467_vm2, %v2319_v23, %v2324_v42 }
 0x46c   : > { %v2068_v41 = vpack.c.bf16 %v1098_v38, %v1097_v34  ;;  %v2117_v44 = vpack.c.bf16 %v1092_v37, %v1091_v35  ;;  %v3182_v45 = vpop.permute.xlu0 %2327  ;;  %v2348_v50 = vpop.permute.xlu1 %2347  ;;  %v2066_v46 = vpack.c.bf16 %v1095_v39, %v1094_v33  ;;  %v1144_v16 = vsel %vm487_vm3, %v2270_v18, %v2309_v52 }
 0x46d   : > { %v2350_v49 = vunpack.i.h.bf16 %v2348_v50  ;;  %v2349_v51 = vunpack.i.l.bf16 %v2348_v50  ;;  %v2330_v33 = vunpack.i.h.bf16 %v3182_v45  ;;  %v2329_v12 = vunpack.i.l.bf16 %v3182_v45 }
 0x46e   : > { %2067 = vmatprep.subr.bf16.mxu0 %v2066_v46  ;;  %2118 = vmatpush1.bf16.msra.mxu1 %v2117_v44  ;;  %v2340_v52 = vunpack.i.h.bf16 %v3160_v13 }
 0x46f   : > { %2069 = vmatpush1.bf16.msra.mxu0 %v2068_v41  ;;  %2119 = vmatprep.subr.bf16.mxu1 %v2559_v0  ;;  %v1122_v59 = vsel %vm477_vm4, %v2349_v51, %v2350_v49  ;;  %v1171_v46 = vsel %vm497_vm5, %v2329_v12, %v2330_v33  ;;  %v1174_v53 = vsel %vm497_vm5, %v2334_v56, %v2329_v12 }
 0x470   : > { %v3196_v62 = vpop.permute.xlu0 %2342  ;;  %v1116_v63 = vpop.permute.xlu1 %1115  ;;  %2071 = vmatprep.subr.bf16.mxu0 %v2070_v54  ;;  %v2074_v15 = vpack.c.bf16 %v1147_v14, %v1122_v59  ;;  %v1177_v17 = vsel %vm497_vm5, %v2330_v33, %v2334_v56  ;;  %v2086_v54 = vpack.c.bf16 %v1171_v46, %v3044_v58  ;;  %v2088_v13 = vpack.c.bf16 %v1174_v53, %v3041_v57 }
 0x471   : > { %v1119_v8 = vsel %vm477_vm4, %v2350_v49, %v1116_v63  ;;  %v1125_v10 = vsel %vm477_vm4, %v1116_v63, %v2349_v51  ;;  %v2344_v48 = vunpack.i.l.bf16 %v3196_v62  ;;  %v2335_v51 = vunpack.i.h.bf16 %v3156_v11 }
 0x472   : > { %2121 = vmatpush1.bf16.msra.mxu1 %v2120_v61  ;;  %v2076_v22 = vpack.c.bf16 %v1150_v19, %v1125_v10  ;;  %v2123_v23 = vpack.c.bf16 %v1144_v16, %v1119_v8  ;;  %v2345_v43 = vunpack.i.h.bf16 %v3196_v62  ;;  %v2132_v62 = vpack.c.bf16 %v1177_v17, %v3066_v4 }
 0x473   : > { %2073 = vmatpush1.bf16.msra.mxu0 %v2072_v5  ;;  %2122 = vmatprep.subr.bf16.mxu1 %v2559_v0  ;;  %v1198_v28 = vsel %vm507_vm7, %v2339_v36, %v2344_v48 }
 0x474   : > { %v2358_v29 = vpop.permute.xlu0 %2357  ;;  %v2353_v27 = vpop.permute.xlu1 %2352  ;;  %2075 = vmatprep.subr.bf16.mxu0 %v2074_v15  ;;  %v1199_v14 = vsel %vm507_vm7, %v2340_v52, %v2345_v43 }
 0x475   : > { %v2360_v31 = vunpack.i.h.bf16 %v2358_v29  ;;  %v2359_v30 = vunpack.i.l.bf16 %v2358_v29  ;;  %v2355_v7 = vunpack.i.h.bf16 %v2353_v27  ;;  %v2354_v42 = vunpack.i.l.bf16 %v2353_v27 }
 0x476   : > { %2124 = vmatpush1.bf16.msra.mxu1 %v2123_v23 }
 0x477   : > { %2077 = vmatpush1.bf16.msra.mxu0 %v2076_v22  ;;  %v1148_v18 = vsel %vm487_vm3, %v2310_v21, %v2355_v7  ;;  %v1149_v38 = vsel %vm487_vm3, %v2354_v42, %v2359_v30  ;;  %2125 = vmatprep.subr.bf16.mxu1 %v2559_v0  ;;  %v1151_v35 = vsel %vm487_vm3, %v2360_v31, %v2310_v21 }
 0x478   : > { %v2368_v32 = vpop.permute.xlu0 %2367  ;;  %v1143_v20 = vpop.permute.xlu1 %1142  ;;  %v2078_v34 = vpack.c.bf16 %v1149_v38, %v1148_v18  ;;  %v1145_v37 = vsel %vm487_vm3, %v2355_v7, %v2360_v31  ;;  %v2094_v7 = vpack.c.bf16 %v1199_v14, %v1198_v28 }
 0x479   : > { %v1146_v39 = vsel %vm487_vm3, %v2359_v30, %v1143_v20  ;;  %v1152_v40 = vsel %vm487_vm3, %v1143_v20, %v2354_v42  ;;  %v2370_v49 = vunpack.i.h.bf16 %v2368_v32 }
 0x47a   : > { %v2080_v41 = vpack.c.bf16 %v1152_v40, %v1151_v35  ;;  %v2126_v44 = vpack.c.bf16 %v1146_v39, %v1145_v37  ;;  %2079 = vmatprep.subr.bf16.mxu0 %v2078_v34 }
 0x47b   : > { %v1172_v8 = vsel %vm497_vm5, %v2335_v51, %v2370_v49 }
 0x47c   : > { %v1158_v45 = vpop.permute.xlu0 %1157  ;;  %v2363_v50 = vpop.permute.xlu1 %2362  ;;  %2081 = vmatpush1.bf16.msra.mxu0 %v2080_v41  ;;  %2127 = vmatpush1.bf16.msra.mxu1 %v2126_v44 }
 0x47d   : > { %2083 = vmatprep.subr.bf16.mxu0 %v2082_v1  ;;  %2128 = vmatprep.subr.bf16.mxu1 %v2559_v0  ;;  %v2369_v1 = vunpack.i.l.bf16 %v2368_v32  ;;  %v2365_v11 = vunpack.i.h.bf16 %v2363_v50  ;;  %v2364_v63 = vunpack.i.l.bf16 %v2363_v50 }
 0x47f   : > { %v1201_v15 = vsel %vm507_vm7, %v2364_v63, %v2339_v36  ;;  %v1202_v16 = vsel %vm507_vm7, %v2365_v11, %v2340_v52  ;;  %v1205_v31 = vsel %vm507_vm7, %v2345_v43, %v2365_v11  ;;  %v1204_v30 = vsel %vm507_vm7, %v2344_v48, %v2364_v63 }
 0x480   : > { %v2388_v59 = vpop.permute.xlu0 %2387  ;;  %v2373_v61 = vpop.permute.xlu1 %2372  ;;  %2085 = vmatpush1.bf16.msra.mxu0 %v2084_v2  ;;  %2130 = vmatpush1.bf16.msra.mxu1 %v2129_v3  ;;  %v1176_v2 = vsel %vm497_vm5, %v1158_v45, %v2369_v1  ;;  %v2096_v33 = vpack.c.bf16 %v1202_v16, %v1201_v15  ;;  %v2138_v32 = vpack.c.bf16 %v1205_v31, %v1204_v30 }
 0x481   : > { %v2375_v58 = vunpack.i.h.bf16 %v2373_v61  ;;  %v2374_v5 = vunpack.i.l.bf16 %v2373_v61  ;;  %2087 = vmatprep.subr.bf16.mxu0 %v2086_v54  ;;  %2131 = vmatprep.subr.bf16.mxu1 %v2559_v0  ;;  %v2390_v22 = vunpack.i.h.bf16 %v2388_v59  ;;  %v2389_v23 = vunpack.i.l.bf16 %v2388_v59 }
 0x483   : > { %v1178_v47 = vsel %vm497_vm5, %v2370_v49, %v2375_v58  ;;  %v1175_v55 = vsel %vm497_vm5, %v2375_v58, %v2335_v51  ;;  %v1179_v60 = vsel %vm497_vm5, %v2374_v5, %v1158_v45  ;;  %v1173_v57 = vsel %vm497_vm5, %v2369_v1, %v2374_v5 }
 0x484   : > { %v1185_v3 = vpop.permute.xlu0 %1184  ;;  %v2378_v4 = vpop.permute.xlu1 %2377  ;;  %2089 = vmatpush1.bf16.msra.mxu0 %v2088_v13  ;;  %2133 = vmatpush1.bf16.msra.mxu1 %v2132_v62  ;;  %v2090_v10 = vpack.c.bf16 %v1173_v57, %v1172_v8  ;;  %v2092_v29 = vpack.c.bf16 %v1176_v2, %v1175_v55  ;;  %v2135_v27 = vpack.c.bf16 %v1179_v60, %v1178_v47 }
 0x485   : > { %v2380_v19 = vunpack.i.h.bf16 %v2378_v4  ;;  %v2379_v21 = vunpack.i.l.bf16 %v2378_v4  ;;  %2134 = vmatprep.subr.bf16.mxu1 %v2559_v0  ;;  %v1200_v35 = vsel %vm507_vm7, %v2389_v23, %v2390_v22  ;;  %v1203_v41 = vsel %vm507_vm7, %v1185_v3, %v2389_v23 }
 0x486   : > { %2091 = vmatprep.subr.bf16.mxu0 %v2090_v10  ;;  %v1206_v50 = vsel %vm507_vm7, %v2390_v22, %v1185_v3  ;;  %v1043_v22 = vld [vmem:[#allocation2] sm:$0xff] }
 0x487   : > { %v1225_v38 = vsel %vm517_vm6, %v2379_v21, %v2380_v19 }
 0x488   : > { %v2393_v42 = vpop.permute.xlu0 %2392  ;;  %v2383_v18 = vpop.permute.xlu1 %2382  ;;  %2093 = vmatpush1.bf16.msra.mxu0 %v2092_v29  ;;  %2136 = vmatpush1.bf16.msra.mxu1 %v2135_v27  ;;  %v2098_v40 = vpack.c.bf16 %v1225_v38, %v1200_v35 }
 0x489   : > { %v2384_v12 = vunpack.i.l.bf16 %v2383_v18  ;;  %2095 = vmatprep.subr.bf16.mxu0 %v2094_v7  ;;  %2137 = vmatprep.subr.bf16.mxu1 %v2559_v0  ;;  %v2395_v20 = vunpack.i.h.bf16 %v2393_v42  ;;  %v2385_v34 = vunpack.i.h.bf16 %v2383_v18  ;;  %v2394_v46 = vunpack.i.l.bf16 %v2393_v42 }
 0x48b   : > { %v1228_v37 = vsel %vm517_vm6, %v2384_v12, %v2379_v21  ;;  %v1231_v39 = vsel %vm517_vm6, %v2380_v19, %v2384_v12  ;;  %v1226_v53 = vsel %vm517_vm6, %v2385_v34, %v2395_v20 }
 0x48c   : > { %v1212_v44 = vpop.permute.xlu0 %1211  ;;  %v2398_v45 = vpop.permute.xlu1 %2397  ;;  %2097 = vmatpush1.bf16.msra.mxu0 %v2096_v33  ;;  %2139 = vmatpush1.bf16.msra.mxu1 %v2138_v32  ;;  %v2100_v49 = vpack.c.bf16 %v1228_v37, %v1203_v41  ;;  %v2141_v51 = vpack.c.bf16 %v1231_v39, %v1206_v50  ;;  %v3332_v37 = vld [vmem:[#allocation5] sm:$0xff] }
 0x48d   : > { %v2400_v56 = vunpack.i.h.bf16 %v2398_v45  ;;  %v2399_v48 = vunpack.i.l.bf16 %v2398_v45  ;;  %2099 = vmatprep.subr.bf16.mxu0 %v2098_v40  ;;  %2140 = vmatprep.subr.bf16.mxu1 %v2559_v0  ;;  %v1230_v43 = vsel %vm517_vm6, %v1212_v44, %v2394_v46 }
 0x48f   : > { %v1232_v17 = vsel %vm517_vm6, %v2395_v20, %v2400_v56  ;;  %v1229_v54 = vsel %vm517_vm6, %v2400_v56, %v2385_v34  ;;  %v1233_v52 = vsel %vm517_vm6, %v2399_v48, %v1212_v44  ;;  %v1227_v36 = vsel %vm517_vm6, %v2394_v46, %v2399_v48 }
 0x490   : > { %v2408_v1 = vpop.permute.xlu0 %2407  ;;  %v2403_v59 = vpop.permute.xlu1 %2402  ;;  %2101 = vmatpush1.bf16.msra.mxu0 %v2100_v49  ;;  %2142 = vmatpush1.bf16.msra.mxu1 %v2141_v51  ;;  %v2102_v61 = vpack.c.bf16 %v1227_v36, %v1226_v53  ;;  %v2104_v13 = vpack.c.bf16 %v1230_v43, %v1229_v54  ;;  %v2144_v62 = vpack.c.bf16 %v1233_v52, %v1232_v17  ;;  %v1409_v49 = vld [vmem:[%s3420_s7] sm:$0xff] }
 0x491   : > { %v2410_v11 = vunpack.i.h.bf16 %v2408_v1  ;;  %v2409_v63 = vunpack.i.l.bf16 %v2408_v1  ;;  %v2405_v58 = vunpack.i.h.bf16 %v2403_v59  ;;  %v2404_v5 = vunpack.i.l.bf16 %v2403_v59  ;;  %2143 = vmatprep.subr.bf16.mxu1 %v2559_v0 }
 0x492   : > { %2103 = vmatprep.subr.bf16.mxu0 %v2102_v61 }
 0x493   : > { %v1252_v8 = vsel %vm527_vm8, %v2404_v5, %v2409_v63  ;;  %v1253_v28 = vsel %vm527_vm8, %v2405_v58, %v2410_v11 }
 0x494   : > { %v1245_v47 = vpop.permute.xlu0 %1244  ;;  %v2413_v55 = vpop.permute.xlu1 %2412  ;;  %2105 = vmatpush1.bf16.msra.mxu0 %v2104_v13  ;;  %2145 = vmatpush1.bf16.msra.mxu1 %v2144_v62  ;;  %v2106_v60 = vpack.c.bf16 %v1253_v28, %v1252_v8  ;;  %v2426_v13 = vld [vmem:[%s2763_s23] sm:$0xff]  ;;  %v2427_v8 = vld [vmem:[%s2763_s23 + $0x8] sm:$0xff] }
 0x495   : > { %v2415_v57 = vunpack.i.h.bf16 %v2413_v55  ;;  %v2414_v2 = vunpack.i.l.bf16 %v2413_v55  ;;  %2146 = vmatprep.subr.bf16.mxu1 %v2559_v0 }
 0x496   : > { %2107 = vmatprep.subr.bf16.mxu0 %v2106_v60 }
 0x497   : > { %v1259_v3 = vsel %vm527_vm8, %v2410_v11, %v2415_v57  ;;  %v1255_v4 = vsel %vm527_vm8, %v2414_v2, %v2404_v5  ;;  %v1256_v10 = vsel %vm527_vm8, %v2415_v57, %v2405_v58  ;;  %v1258_v14 = vsel %vm527_vm8, %v2409_v63, %v2414_v2 }
 0x498   : > { %v2108_v15 = vpack.c.bf16 %v1256_v10, %v1255_v4  ;;  %v2147_v16 = vpack.c.bf16 %v1259_v3, %v1258_v14  ;;  %v1251_v19 = vpop.permute.xlu1 %1250  ;;  %v1239_v0 = vpop.permute.xlu0 %1238 }
 0x499   : > { %v1254_v21 = vsel %vm527_vm8, %v1245_v47, %v1251_v19  ;;  %v1257_v23 = vsel %vm527_vm8, %v1239_v0, %v1245_v47  ;;  %v1260_v29 = vsel %vm527_vm8, %v1251_v19, %v1239_v0  ;;  %v2428_v47 = vld [vmem:[%s2763_s23 + $0x10] sm:$0xff]  ;;  %s2571_s23 = smov [#allocation7]  }
 0x49a   : > { %2109 = vmatpush1.bf16.msra.mxu0 %v2108_v15  ;;  %2148 = vmatpush1.bf16.msra.mxu1 %v2147_v16  ;;  %s2489_s30 = sshll.u32 %s2571_s23, 4  ;;  %s2490_s30 = int_to_ptr.vmem [resolvable:$false] %s2489_s30 }
 0x49b   : > { %1317 = vmatprep.subr.mxu0 %v1254_v21  ;;  %1388 = vmatprep.subr.mxu1 %v2566_v6  ;;  %s2491_s26 = scalar_lea.vmem %s2490_s30, 768  ;;  %p2492_p4 = scmp.lt.s32.totalorder %s3373_s29, %s2490_s30 }
 0x49c   : > { %p2493_p7 = scmp.lt.s32.totalorder %s2491_s26, %s2485_s14 }
 0x49e   : > { %1318 = vmatpush1.msra.mxu0 %v1257_v23  ;;  %1389 = vmatpush1.msra.mxu1 %v1260_v29  ;;  %p2494_p8 = por %p2493_p7, %p2492_p4 }
 0x49f   : > { %1330 = vmatmul.mubr.f32.vlgmr.msra.gmra.mrb[12].mxu0 %v1043_v22  ;;  %1401 = vmatmul.mubr.f32.vlgmr.msra.gmra.mrb[12].mxu1 %v1043_v22 }
 0x4a0   : > { %2004 = vmatprep.subr.mxu0 %v2566_v6  ;;  %2006 = vmatprep.mubr.msk.f32.mxu0 %vm2568_vm0, %v2566_v6  ;;  %p2495_p11 = pnand %p2494_p8, %p2488_p3 }
 0x4a1   : > { %2009 = vmatprep.subr.mxu1 %v2566_v6  ;;  %2011 = vmatprep.mubr.msk.f32.mxu1 %vm2568_vm0, %v2566_v6 }
 0x572   : > { %v1331_v27 = vpop.f32.mrb[12].mxu0  ;;  %v1402_v31 = vpop.f32.mrb[12].mxu1 }
 0x573   : > { %v1406_v30 = vmul.f32 %v1331_v27, %v2905_v24  ;;  %v1333_v9 = vpop.f32.mrb[13].mxu0  ;;  %v1408_v7 = vmul.f32 %v1402_v31, %v2909_v26  ;;  %v1404_v42 = vpop.f32.mrb[13].mxu1  ;;  %v1605_v31 = vld [vmem:[%s3423_s10] sm:$0xff] }
 0x574   : > { %v1407_v18 = vmul.f32 %v1333_v9, %v2907_v25  ;;  %v1604_v42 = vld [vmem:[%s3422_s9] sm:$0xff] }
 0x575   : > { %v1415_v38 = vmul.f32 %v1406_v30, %v1406_v30  ;;  %v1417_v32 = vmul.f32 %v1408_v7, %v1408_v7 }
 0x576   : > { %v1416_v33 = vmul.f32 %v1407_v18, %v1407_v18  ;;  %v1411_v12 = vadd.f32 %v1407_v18, %v1406_v30 }
 0x578   : > { %v1412_v20 = vadd.f32 %v1411_v12, %v1408_v7  ;;  %v1418_v34 = vadd.f32 %v1416_v33, %v1415_v38 }
 0x57a   : > { %1413 = vadd.xlane.f32.xlu1 %v1412_v20  ;;  %v1419_v35 = vadd.f32 %v1418_v34, %v1417_v32 }
 0x57c   : > { %1420 = vadd.xlane.f32.xlu0 %v1419_v35 }
 0x607   : > { %v1414_v39 = vpop.xlane.xlu1 %1413 }
 0x608   : > { %2005 = vmatpush3.msra.mxu0 %v1414_v39 }
 0x609   : > { %v1421_v40 = vpop.xlane.xlu0 %1420  ;;  %2007 = vmatmul.mubr.msk.f32.vlgmr.msra.gmra.mrb[14].mxu0 %vm1422_vm12, %v3332_v37  ;;  %2014 = vmatprep.subr.mxu0 %v2566_v6 }
 0x60a   : > { %2010 = vmatpush3.msra.mxu1 %v1421_v40  ;;  %2016 = vmatprep.mubr.msk.f32.mxu0 %vm2568_vm0, %v2566_v6 }
 0x60b   : > { %2012 = vmatmul.mubr.msk.f32.vlgmr.msra.gmra.mrb[14].mxu1 %vm1422_vm12, %v3332_v37  ;;  %2019 = vmatprep.subr.mxu1 %v2566_v6 }
 0x60c   : > { %2021 = vmatprep.mubr.msk.f32.mxu1 %vm2568_vm0, %v2566_v6  ;;  %v1410_v6 = vld [vmem:[%s3421_s8] sm:$0xff] }
 0x6dc   : > { %v1492_v41 = vpop.f32.mrb[14].mxu0 }
 0x6dd   : > { %v1566_v44 = vmul.f32 %v1492_v41, %v1492_v41  ;;  %1572 = vperm.xlu0 %2259, %v1492_v41   ;;  %v2008_v45 = vpop.f32.mrb[15].mxu0 }
 0x6de   : > { %v1562_v50 = vpop.f32.mrb[14].mxu1 }
 0x6df   : > { %v1567_v46 = vsub.f32 %v1562_v50, %v1566_v44  ;;  %v2013_v56 = vpop.f32.mrb[15].mxu1 }
 0x6e1   : > { %v1568_v48 = vadd.f32 1e-05, %v1567_v46 }
 0x6e3   : > { %2422 = vrsqrt.f32 %v1568_v48 }
 0x6ed   : > { %v2423_v51 = vpop.eup %2422 }
 0x6ee   : > { %v1578_v53 = vmul.f32 %v2423_v51, %v1409_v49 }
 0x6f0   : > { %1581 = vperm.xlu1 %2260, %v1578_v53  }
 0x6f4   : > { %1589 = vperm.xlu1 %2260, %v1410_v6  }
 0x75c   : > { %v1573_v17 = vpop.permute.xlu0 %1572 }
 0x75d   : > { %v1575_v52 = vsub.f32 %v1406_v30, %v1573_v17  ;;  %v1576_v36 = vsub.f32 %v1407_v18, %v1573_v17  ;;  %v1577_v43 = vsub.f32 %v1408_v7, %v1573_v17 }
 0x76f   : > { %v1582_v54 = vpop.permute.xlu1 %1581 }
 0x770   : > { %v1584_v1 = vmul.f32 %v1582_v54, %v1575_v52  ;;  %v1585_v59 = vmul.f32 %v1582_v54, %v1576_v36  ;;  %v1586_v61 = vmul.f32 %v1582_v54, %v1577_v43 }
 0x773   : > { %v1590_v11 = vpop.permute.xlu1 %1589 }
 0x774   : > { %v1592_v63 = vadd.f32 %v1590_v11, %v1584_v1  ;;  %v1593_v58 = vadd.f32 %v1590_v11, %v1585_v59  ;;  %v1594_v5 = vadd.f32 %v1590_v11, %v1586_v61 }
 0x776   : > { %v1595_v62 = vadd.f32 %v2426_v13, %v1592_v63  ;;  %v1596_v28 = vadd.f32 %v2427_v8, %v1593_v58  ;;  %v1597_v55 = vadd.f32 %v2428_v47, %v1594_v5 }
 0x778   : > { %v1598_v60 = vmax.f32 %v1595_v62, 0.0  ;;  %v1599_v57 = vmax.f32 %v1596_v28, 0.0  ;;  %v1600_v2 = vmax.f32 %v1597_v55, 0.0 }
 0x77a   : > { %v1601_v3 = vmul.f32 %v1598_v60, %v2905_v24  ;;  %v1602_v4 = vmul.f32 %v1599_v57, %v2907_v25  ;;  %v1603_v10 = vmul.f32 %v1600_v2, %v2909_v26 }
 0x77c   : > { %v1606_v14 = vadd.f32 %v1602_v4, %v1601_v3  ;;  %v1610_v15 = vmul.f32 %v1601_v3, %v1601_v3  ;;  %v1611_v16 = vmul.f32 %v1602_v4, %v1602_v4  ;;  %v1612_v21 = vmul.f32 %v1603_v10, %v1603_v10 }
 0x77e   : > { %v1607_v19 = vadd.f32 %v1606_v14, %v1603_v10  ;;  %v1613_v0 = vadd.f32 %v1611_v16, %v1610_v15 }
 0x780   : > { %1608 = vadd.xlane.f32.xlu0 %v1607_v19  ;;  %v1614_v22 = vadd.f32 %v1613_v0, %v1612_v21 }
 0x782   : > { %1615 = vadd.xlane.f32.xlu1 %v1614_v22 }
 0x80d   : > { %v1609_v23 = vpop.xlane.xlu0 %1608 }
 0x80e   : > { %2015 = vmatpush3.msra.mxu0 %v1609_v23 }
 0x80f   : > { %v1616_v29 = vpop.xlane.xlu1 %1615  ;;  %2017 = vmatmul.mubr.msk.f32.vlgmr.msra.gmra.mrb[16].mxu0 %vm1422_vm12, %v3332_v37 }
 0x810   : > { %2020 = vmatpush3.msra.mxu1 %v1616_v29 }
 0x811   : > { %2022 = vmatmul.mubr.msk.f32.vlgmr.msra.gmra.mrb[16].mxu1 %vm1422_vm12, %v3332_v37 }
 0x8e2   : > { %v1683_v24 = vpop.f32.mrb[16].mxu0 }
 0x8e3   : > { %v1757_v25 = vmul.f32 %v1683_v24, %v1683_v24  ;;  %1763 = vperm.xlu0 %2259, %v1683_v24   ;;  %v2018_v26 = vpop.f32.mrb[17].mxu0 }
 0x8e4   : > { %v1753_v27 = vpop.f32.mrb[16].mxu1 }
 0x8e5   : > { %v1758_v30 = vsub.f32 %v1753_v27, %v1757_v25  ;;  %v2023_v9 = vpop.f32.mrb[17].mxu1 }
 0x8e7   : > { %v1759_v7 = vadd.f32 1e-05, %v1758_v30  ;;  %1780 = vperm.xlu0 %2259, %v1605_v31  }
 0x8e9   : > { %2424 = vrsqrt.f32 %v1759_v7 }
 0x8f3   : > { %v2425_v18 = vpop.eup %2424 }
 0x8f4   : > { %v1769_v38 = vmul.f32 %v2425_v18, %v1604_v42 }
 0x8f6   : > { %1772 = vperm.xlu1 %2260, %v1769_v38  }
 0x962   : > { %v1764_v33 = vpop.permute.xlu0 %1763 }
 0x963   : > { %v1766_v12 = vsub.f32 %v1601_v3, %v1764_v33  ;;  %v1767_v32 = vsub.f32 %v1602_v4, %v1764_v33  ;;  %v1768_v20 = vsub.f32 %v1603_v10, %v1764_v33 }
 0x966   : > { %v1781_v40 = vpop.permute.xlu0 %1780 }
 0x975   : > { %v1773_v34 = vpop.permute.xlu1 %1772 }
 0x976   : > { %v1775_v35 = vmul.f32 %v1773_v34, %v1766_v12  ;;  %v1776_v37 = vmul.f32 %v1773_v34, %v1767_v32  ;;  %v1777_v39 = vmul.f32 %v1773_v34, %v1768_v20 }
 0x978   : > { %v1783_v41 = vadd.f32 %v1781_v40, %v1775_v35  ;;  %v1784_v44 = vadd.f32 %v1781_v40, %v1776_v37  ;;  %v1785_v45 = vadd.f32 %v1781_v40, %v1777_v39 }
 0x97a   : > { %1786 = vst [vmem:[%s432_s28] sm:$0xff] %v1783_v41  ;;  %1787 = vst [vmem:[%s432_s28 + $0x8] sm:$0xff] %v1784_v44 }
 0x97b   : > { %1788 = vst [vmem:[%s432_s28 + $0x10] sm:$0xff] %v1785_v45 }
 0x97c   : > { %2498 = shalt.err (!%p2495_p11)
}
 0x97d   : > { %s2499_s20 = scalar_lea.hbm %s3371_s27, 384  ;;  %s2503_s17 = scalar_lea.hbm %s3425_s12, 768 }
 0x97e   : > { %p2500_p13 = scmp.ne.s32.totalorder %s3371_s27, %s2499_s20  ;;  %p2504_p5 = scmp.lt.u32.totalorder %s3371_s27, %s3425_s12 }
 0x97f   : > { %p2505_p9 = scmp.lt.u32.totalorder %s2503_s17, %s2499_s20  ;;  %p2507_p12 = scmp.lt.u32.totalorder %s2499_s20, %s3371_s27 }
 0x980   : > { %p2501_p6 = pnand %p2500_p13, %p3455_p1 }
 0x981   : > { %p2506_p10 = por %p2505_p9, %p2504_p5 }
 0x982   : > { %p2502_p0 = pneg %p2501_p6 }
 0x983   : > { %p2508_p2 = por %p2507_p12, %p2506_p10 }
 0x985   : > { %p2509_p3 = pnand %p2508_p2, %p2502_p0 }
 0x987   : > { %2512 = shalt.err (!%p2509_p3)
}
 0x988   : > { %2160 = dma.vmem_to_hbm [thread:$0]  (%p3455_p1), %s3373_s29, 384, %s3371_s27, %s1790_s25  }
 0x989 PF: > { %s3456_s18 = sld [smem:[#allocation14_spill]]  ;;  %p2177_p4 = scmp.ge.s32.totalorder %s2555_s24, 2 }
 0x98a   : > { %s1816_s14 = sand.u32 1, %s2543_s21  }
 0x98b   : > { %s1817_s23 = scalar_lea.sflag [#allocation4], %s1816_s14 }
 0x98f   : > { %p3457_p7 = scmp.ne.s32.totalorder %s3456_s18, 0 }
 0x991   : > { %p2170_p8 = pnand %p2177_p4, %p3457_p7 }
 0x993   : > { %2538 = dma.done.wait (!%p2170_p8), %s1817_s23, 384  }
 0x994   : > { %2540 = vsyncadd (!%p2170_p8), %s1817_s23, 4294966912  ;;  %s3458_s24 = sld [smem:[#allocation12_spill]]  ;;  %s3459_s30 = sld [smem:[#allocation11_spill]] }
 0x995   : > { %s3460_s23 = sld [smem:[#allocation13_spill]]  ;;  %s3461_s21 = smov %s2547_s22 }
 0x99a   : > { %p24_p11 = scmp.ge.s32.totalorder %s3458_s24, 4   ;;  %s3462_s22 = smov %s3459_s30 }
 0x99c   :  { %26 = sbr.rel (!%p24_p11) target bundleno = 5 (0x5), region = 112 }
 0x9a3   :  { %1822 = vsyncpa [#allocation3], 1 }
 0x9a4   :  { %1824 = vsyncpa [#allocation3 + $0x1], 1 }
 0x9a5   :  { %1825 = vsyncpa [#allocation6], 1 }
 0x9a6   :  { %1826 = vsyncpa [#allocation4], 1 }
 0x9a7   :  { %1828 = vsyncpa [#allocation4 + $0x1], 1 }

</bundles_post_ra>
